<compile_context>
chip_gen: v7x
topology: tpu7x:2x2x1
jax: 0.10.0
libtpu: 0.0.40
codegen_flags: <defaults>
</compile_context>

<pallas_src>
import math

import jax
import jax.numpy as jnp
from jax.experimental import pallas as pl
from jax.experimental.pallas import tpu as pltpu

_H1, _H2 = 512, 256
_LANE = 128
_TILE_CAP = 1024  # max batch rows per tile: <4 MiB of f32 activations


def _sac_actor_kernel(x_ref, w1_ref, b1_ref, w2_ref, b2_ref, w3_ref, b3_ref, o_ref):
    # One batch tile per grid step. Weights/biases have constant index_maps so
    # they are DMA'd once and stay resident in VMEM across all tiles.
    x = x_ref[...].astype(jnp.bfloat16)                                 # in-kernel cast (VPU)
    h1 = jnp.dot(x, w1_ref[...], preferred_element_type=jnp.float32)   # (TB, 512) f32 acc
    h1 = jnp.maximum(h1 + b1_ref[...], 0.0).astype(jnp.bfloat16)       # bias + ReLU in f32
    h2 = jnp.dot(h1, w2_ref[...], preferred_element_type=jnp.float32)  # (TB, 256)
    h2 = jnp.maximum(h2 + b2_ref[...], 0.0).astype(jnp.bfloat16)
    a = jnp.dot(h2, w3_ref[...], preferred_element_type=jnp.float32)   # (TB, n_out_pad)
    o_ref[...] = (a + b3_ref[...]).astype(o_ref.dtype)                 # lane-dense store


def _choose_tiling(batch):
    """Returns (tile_b, b_pad).

    * B <= 256      : one tile, rounded up to a multiple of 8 (sublane).
    * 256 < B <= cap: one 256-aligned tile (fills v6e/v7x MXU M dimension).
    * B > cap       : >=2 tiles of <=1024 rows, 256-aligned, so the "parallel"
                      batch axis can be split across v7x's two TensorCores.
    """
    if batch <= 256:
        tile_b = max(8, pl.cdiv(batch, 8) * 8)
        return tile_b, tile_b
    if batch <= _TILE_CAP:
        tile_b = pl.cdiv(batch, 256) * 256
        return tile_b, tile_b
    n_tiles = max(2, pl.cdiv(batch, _TILE_CAP))
    tile_b = pl.cdiv(pl.cdiv(batch, n_tiles), 256) * 256
    b_pad = pl.cdiv(batch, tile_b) * tile_b
    return tile_b, b_pad


def init_params(key, n_input, n_output):
    """Matches the PyTorch module's init (shapes + schemes), stored transposed
    as (in_features, out_features) so each layer is x @ W. Biases are (1, F)
    with the nn.Linear default U(-1/sqrt(fan_in), 1/sqrt(fan_in))."""
    sizes = [(n_input, _H1), (_H1, _H2), (_H2, n_output)]
    gains = [math.sqrt(2.0), math.sqrt(2.0), 1.0]
    params = {}
    keys = jax.random.split(key, 6)
    for i, ((fan_in, fan_out), gain) in enumerate(zip(sizes, gains), start=1):
        wb = gain * math.sqrt(6.0 / (fan_in + fan_out))  # xavier_uniform bound
        w = jax.random.uniform(keys[2 * (i - 1)], (fan_in, fan_out),
                               jnp.float32, minval=-wb, maxval=wb)
        bb = 1.0 / math.sqrt(fan_in)
        b = jax.random.uniform(keys[2 * (i - 1) + 1], (1, fan_out),
                               jnp.float32, minval=-bb, maxval=bb)
        params[f"w{i}"] = w
        params[f"b{i}"] = b
    return params


def prepare_params(params):
    """One-time (outside any rollout hot loop) cast of weights to bf16 and
    lane-dense zero-padding of the output head to a multiple of 128 lanes."""
    n_out = params["w3"].shape[1]
    n_out_pad = pl.cdiv(n_out, _LANE) * _LANE
    w3 = jnp.zeros((params["w3"].shape[0], n_out_pad), jnp.float32)
    w3 = w3.at[:, :n_out].set(params["w3"])
    b3 = jnp.zeros((1, n_out_pad), jnp.float32)
    b3 = b3.at[:, :n_out].set(params["b3"])
    prepped = {
        "w1": params["w1"].astype(jnp.bfloat16),
        "b1": params["b1"].astype(jnp.float32),
        "w2": params["w2"].astype(jnp.bfloat16),
        "b2": params["b2"].astype(jnp.float32),
        "w3": w3.astype(jnp.bfloat16),
        "b3": b3,
    }
    return prepped, n_out


def sac_actor_forward(state, prepped, n_out):
    """state: (B, 1, n_input) or (B, n_input). Returns (B, n_output) float32."""
    # Glue: torch.squeeze(state, 1) + .float()
    if state.ndim == 3 and state.shape[1] == 1:
        state = jnp.squeeze(state, axis=1)
    state = state.astype(jnp.float32)   # no-op if already f32; bf16 cast is in-kernel

    B, n_in = state.shape
    n_out_pad = prepped["w3"].shape[1]

    tile_b, b_pad = _choose_tiling(B)
    if b_pad != B:
        # Single pad op; zero rows are sliced off below.
        state = jnp.pad(state, ((0, b_pad - B), (0, 0)))

    flops = 2 * b_pad * (n_in * _H1 + _H1 * _H2 + _H2 * n_out_pad)
    bytes_accessed = (
        b_pad * n_in * 4                                            # x (f32)
        + (n_in * _H1 + _H1 * _H2 + _H2 * n_out_pad) * 2            # weights (bf16)
        + (_H1 + _H2 + n_out_pad) * 4                               # biases (f32)
        + b_pad * n_out_pad * 4                                     # output (f32)
    )

    out = pl.pallas_call(
        _sac_actor_kernel,
        out_shape=jax.ShapeDtypeStruct((b_pad, n_out_pad), jnp.float32),
        grid_spec=pltpu.PrefetchScalarGridSpec(
            num_scalar_prefetch=0,
            grid=(b_pad // tile_b,),
            in_specs=[
                pl.BlockSpec((tile_b, n_in), lambda i: (i, 0)),    # x: tiled over batch
                pl.BlockSpec((n_in, _H1), lambda i: (0, 0)),       # w1 \
                pl.BlockSpec((1, _H1), lambda i: (0, 0)),          # b1  \ constant index_map
                pl.BlockSpec((_H1, _H2), lambda i: (0, 0)),        # w2  / -> VMEM-resident
                pl.BlockSpec((1, _H2), lambda i: (0, 0)),          # b2 /   across all tiles
                pl.BlockSpec((_H2, n_out_pad), lambda i: (0, 0)),  # w3 (lane-padded)
                pl.BlockSpec((1, n_out_pad), lambda i: (0, 0)),    # b3 (lane-padded)
            ],
            out_specs=pl.BlockSpec((tile_b, n_out_pad), lambda i: (i, 0)),
        ),
        compiler_params=pltpu.CompilerParams(
            # Batch tiles are independent: v7x shards them across both
            # TensorCores; harmless no-op on single-TC v5e/v6e.
            dimension_semantics=("parallel",),
        ),
        cost_estimate=pl.CostEstimate(
            flops=flops, transcendentals=0, bytes_accessed=bytes_accessed),
    )(state, prepped["w1"], prepped["b1"], prepped["w2"], prepped["b2"],
      prepped["w3"], prepped["b3"])

    # Consumers that tolerate the padded (b_pad, 128) slab could read `out`
    # directly and skip this slice.
    return out[:B, :n_out]


def _reference_forward_bf16(state, prepped, n_out):
    # Pure-JAX reference computing the same bf16-operand / f32-accumulate math.
    if state.ndim == 3 and state.shape[1] == 1:
        state = jnp.squeeze(state, axis=1)
    x = state.astype(jnp.float32).astype(jnp.bfloat16)
    h1 = jnp.dot(x, prepped["w1"], preferred_element_type=jnp.float32) + prepped["b1"]
    h1 = jnp.maximum(h1, 0.0).astype(jnp.bfloat16)
    h2 = jnp.dot(h1, prepped["w2"], preferred_element_type=jnp.float32) + prepped["b2"]
    h2 = jnp.maximum(h2, 0.0).astype(jnp.bfloat16)
    a = jnp.dot(h2, prepped["w3"], preferred_element_type=jnp.float32) + prepped["b3"]
    return a[:, :n_out]


def _reference_forward_f32(state, params):
    # Full-precision reference matching the original PyTorch f32 forward.
    if state.ndim == 3 and state.shape[1] == 1:
        state = jnp.squeeze(state, axis=1)
    x = state.astype(jnp.float32)
    h1 = jnp.maximum(x @ params["w1"] + params["b1"], 0.0)
    h2 = jnp.maximum(h1 @ params["w2"] + params["b2"], 0.0)
    return h2 @ params["w3"] + params["b3"]


def _check(batch, n_input, n_output, params, prepped, n_out, key):
    state = jax.random.normal(key, (batch, 1, n_input), dtype=jnp.float32)
    out = jax.block_until_ready(sac_actor_forward(state, prepped, n_out))
    assert out.shape == (batch, n_output), out.shape

    ref_bf16 = _reference_forward_bf16(state, prepped, n_out)
    assert jnp.allclose(out, ref_bf16, atol=1e-2, rtol=1e-2), float(
        jnp.max(jnp.abs(out - ref_bf16)))

    # Drift vs. the original f32 PyTorch-equivalent forward (bf16 MXU operands).
    ref_f32 = _reference_forward_f32(state, params)
    max_err = float(jnp.max(jnp.abs(out - ref_f32)))
    assert max_err < 0.1, max_err
    return out


if __name__ == "__main__":
    key = jax.random.PRNGKey(0)
    k_param, k_small, k_big = jax.random.split(key, 3)

    n_input = 16     # input_shape[-1]
    n_output = 4     # output_shape[0]

    params = init_params(k_param, n_input, n_output)
    prepped, n_out = prepare_params(params)  # hoisted out of the "rollout loop"

    # Small batch: single tile, grid=(1,). Emulates the (B, 1, n_input) state.
    _check(200, n_input, n_output, params, prepped, n_out, k_small)
    # Larger batch: exercises batch padding (1500 -> 1536) and a 2-tile
    # 256-aligned grid (the v7x dual-TC / v6e MXU-fill path).
    _check(1500, n_input, n_output, params, prepped, n_out, k_big)

    print("KERNEL_OK")
</pallas_src>

<mosaic_0001>
module attributes {stable_mosaic.version = 11 : i64} {
  func.func @_sac_actor_kernel(%arg0: i32, %arg1: memref<200x16xf32, #tpu.memory_space<vmem>>, %arg2: memref<16x512xbf16, #tpu.memory_space<vmem>>, %arg3: memref<1x512xf32, #tpu.memory_space<vmem>>, %arg4: memref<512x256xbf16, #tpu.memory_space<vmem>>, %arg5: memref<1x256xf32, #tpu.memory_space<vmem>>, %arg6: memref<256x128xbf16, #tpu.memory_space<vmem>>, %arg7: memref<1x128xf32, #tpu.memory_space<vmem>>, %arg8: memref<200x128xf32, #tpu.memory_space<vmem>>) attributes {dimension_semantics = [#tpu.dimension_semantics<parallel>], iteration_bounds = array<i64: 1>, scalar_prefetch = 0 : i64, scratch_operands = 0 : i64, tpu.core_type = #tpu.core_type<tc>, window_params = [{transform_indices = @transform_0, window_bounds = array<i64: 200, 16>}, {pipeline_mode = #tpu.pipeline_mode<synchronous>, transform_indices = @transform_1, window_bounds = array<i64: 16, 512>}, {pipeline_mode = #tpu.pipeline_mode<synchronous>, transform_indices = @transform_2, window_bounds = array<i64: 1, 512>}, {pipeline_mode = #tpu.pipeline_mode<synchronous>, transform_indices = @transform_3, window_bounds = array<i64: 512, 256>}, {pipeline_mode = #tpu.pipeline_mode<synchronous>, transform_indices = @transform_4, window_bounds = array<i64: 1, 256>}, {pipeline_mode = #tpu.pipeline_mode<synchronous>, transform_indices = @transform_5, window_bounds = array<i64: 256, 128>}, {pipeline_mode = #tpu.pipeline_mode<synchronous>, transform_indices = @transform_6, window_bounds = array<i64: 1, 128>}, {transform_indices = @transform_7, window_bounds = array<i64: 200, 128>}]} {
    %c0 = arith.constant 0 : index
    %c0_0 = arith.constant 0 : index
    %0 = vector.load %arg1[%c0, %c0_0] : memref<200x16xf32, #tpu.memory_space<vmem>>, vector<200x16xf32>
    %1 = arith.truncf %0 : vector<200x16xf32> to vector<200x16xbf16>
    %c0_1 = arith.constant 0 : index
    %c0_2 = arith.constant 0 : index
    %2 = vector.load %arg2[%c0_1, %c0_2] : memref<16x512xbf16, #tpu.memory_space<vmem>>, vector<16x512xbf16>
    %cst = arith.constant dense<0.000000e+00> : vector<200x512xf32>
    %3 = tpu.matmul %1, %2, %cst {dimension_numbers = #tpu.dot_dimension_numbers<[1], [0], [0], [1], [0, 0, 1, 1], [], []>} : vector<200x16xbf16>, vector<16x512xbf16>, vector<200x512xf32> -> vector<200x512xf32>
    %c0_3 = arith.constant 0 : index
    %c0_4 = arith.constant 0 : index
    %4 = vector.load %arg3[%c0_3, %c0_4] : memref<1x512xf32, #tpu.memory_space<vmem>>, vector<1x512xf32>
    %5 = vector.broadcast %4 : vector<1x512xf32> to vector<200x512xf32>
    %6 = arith.addf %3, %5 : vector<200x512xf32>
    %cst_5 = arith.constant 0.000000e+00 : f32
    %7 = vector.broadcast %cst_5 : f32 to vector<200x512xf32>
    %8 = arith.maximumf %6, %7 : vector<200x512xf32>
    %9 = arith.truncf %8 : vector<200x512xf32> to vector<200x512xbf16>
    %c0_6 = arith.constant 0 : index
    %c0_7 = arith.constant 0 : index
    %10 = vector.load %arg4[%c0_6, %c0_7] : memref<512x256xbf16, #tpu.memory_space<vmem>>, vector<512x256xbf16>
    %cst_8 = arith.constant dense<0.000000e+00> : vector<200x256xf32>
    %11 = tpu.matmul %9, %10, %cst_8 {dimension_numbers = #tpu.dot_dimension_numbers<[1], [0], [0], [1], [0, 0, 1, 1], [], []>} : vector<200x512xbf16>, vector<512x256xbf16>, vector<200x256xf32> -> vector<200x256xf32>
    %c0_9 = arith.constant 0 : index
    %c0_10 = arith.constant 0 : index
    %12 = vector.load %arg5[%c0_9, %c0_10] : memref<1x256xf32, #tpu.memory_space<vmem>>, vector<1x256xf32>
    %13 = vector.broadcast %12 : vector<1x256xf32> to vector<200x256xf32>
    %14 = arith.addf %11, %13 : vector<200x256xf32>
    %cst_11 = arith.constant 0.000000e+00 : f32
    %15 = vector.broadcast %cst_11 : f32 to vector<200x256xf32>
    %16 = arith.maximumf %14, %15 : vector<200x256xf32>
    %17 = arith.truncf %16 : vector<200x256xf32> to vector<200x256xbf16>
    %c0_12 = arith.constant 0 : index
    %c0_13 = arith.constant 0 : index
    %18 = vector.load %arg6[%c0_12, %c0_13] : memref<256x128xbf16, #tpu.memory_space<vmem>>, vector<256x128xbf16>
    %cst_14 = arith.constant dense<0.000000e+00> : vector<200x128xf32>
    %19 = tpu.matmul %17, %18, %cst_14 {dimension_numbers = #tpu.dot_dimension_numbers<[1], [0], [0], [1], [0, 0, 1, 1], [], []>} : vector<200x256xbf16>, vector<256x128xbf16>, vector<200x128xf32> -> vector<200x128xf32>
    %c0_15 = arith.constant 0 : index
    %c0_16 = arith.constant 0 : index
    %20 = vector.load %arg7[%c0_15, %c0_16] : memref<1x128xf32, #tpu.memory_space<vmem>>, vector<1x128xf32>
    %21 = vector.broadcast %20 : vector<1x128xf32> to vector<200x128xf32>
    %22 = arith.addf %19, %21 : vector<200x128xf32>
    %c0_17 = arith.constant 0 : index
    %c0_18 = arith.constant 0 : index
    %23 = vector.load %arg8[%c0_17, %c0_18] : memref<200x128xf32, #tpu.memory_space<vmem>>, vector<200x128xf32>
    tpu.vector_store %arg8[%c0_17, %c0_18], %22 {strides = array<i32>} : memref<200x128xf32, #tpu.memory_space<vmem>>, vector<200x128xf32>,
    return
  }
  func.func @transform_0(%arg0: i32) -> (i32, i32) {
    %c0_i32 = arith.constant 0 : i32
    %c0_i32_0 = arith.constant 0 : i32
    return %arg0, %c0_i32 : i32, i32
  }
  func.func @transform_1(%arg0: i32) -> (i32, i32) {
    %c0_i32 = arith.constant 0 : i32
    %c0_i32_0 = arith.constant 0 : i32
    %c0_i32_1 = arith.constant 0 : i32
    return %c0_i32, %c0_i32_0 : i32, i32
  }
  func.func @transform_2(%arg0: i32) -> (i32, i32) {
    %c0_i32 = arith.constant 0 : i32
    %c0_i32_0 = arith.constant 0 : i32
    %c0_i32_1 = arith.constant 0 : i32
    return %c0_i32, %c0_i32_0 : i32, i32
  }
  func.func @transform_3(%arg0: i32) -> (i32, i32) {
    %c0_i32 = arith.constant 0 : i32
    %c0_i32_0 = arith.constant 0 : i32
    %c0_i32_1 = arith.constant 0 : i32
    return %c0_i32, %c0_i32_0 : i32, i32
  }
  func.func @transform_4(%arg0: i32) -> (i32, i32) {
    %c0_i32 = arith.constant 0 : i32
    %c0_i32_0 = arith.constant 0 : i32
    %c0_i32_1 = arith.constant 0 : i32
    return %c0_i32, %c0_i32_0 : i32, i32
  }
  func.func @transform_5(%arg0: i32) -> (i32, i32) {
    %c0_i32 = arith.constant 0 : i32
    %c0_i32_0 = arith.constant 0 : i32
    %c0_i32_1 = arith.constant 0 : i32
    return %c0_i32, %c0_i32_0 : i32, i32
  }
  func.func @transform_6(%arg0: i32) -> (i32, i32) {
    %c0_i32 = arith.constant 0 : i32
    %c0_i32_0 = arith.constant 0 : i32
    %c0_i32_1 = arith.constant 0 : i32
    return %c0_i32, %c0_i32_0 : i32, i32
  }
  func.func @transform_7(%arg0: i32) -> (i32, i32) {
    %c0_i32 = arith.constant 0 : i32
    %c0_i32_0 = arith.constant 0 : i32
    return %arg0, %c0_i32 : i32, i32
  }
}

</mosaic_0001>

<bundles_post_ra>
// kernel: tpu_custom_call.1
= control target key start
LH: loop header
LB: loop body
LE: loop exit
PB: predicated region body
PF: predicated region fallthrough
CT: control target
= control target key end

     0   :  { %12 = vsyncpa [#allocation3], 0  ;;  %s2931_s0 = inlined_call_operand.vmem [shape: f32[200,16], index: 0, kind: input, shape index: {}]   ;;  %s2932_s1 = inlined_call_operand.vmem [shape: bf16[16,512], index: 1, kind: input, shape index: {}]   ;;  %s2933_s2 = inlined_call_operand.vmem [shape: f32[1,512], index: 2, kind: input, shape index: {}]   ;;  %s2934_s3 = inlined_call_operand.hbm [shape: bf16[512,256], index: 3, kind: input, shape index: {}]   ;;  %s2935_s4 = inlined_call_operand.vmem [shape: f32[1,256], index: 4, kind: input, shape index: {}]   ;;  %s2936_s5 = inlined_call_operand.vmem [shape: bf16[256,128], index: 5, kind: input, shape index: {}]   ;;  %s2937_s6 = inlined_call_operand.vmem [shape: f32[1,128], index: 6, kind: input, shape index: {}]   ;;  %s2938_s7 = inlined_call_operand.hbm [shape: f32[200,128], index: 7, kind: output, shape index: {}]  }
   0x1   :  { %13 = vsyncpa [#allocation4], 0  ;;  %s2255_s24 = smov [#allocation2]   ;;  %s2207_s28 = scalar_lea.hbm %s2934_s3, 8192 }
   0x2   :  { %s25_s25 = sshll.u32 %s2255_s24, 4  ;;  %p2208_p0 = scmp.ne.s32.totalorder %s2934_s3, %s2207_s28  ;;  %s26_s25 = int_to_ptr.vmem [resolvable:$true] %s25_s25 }
   0x3   :  { %p2211_p1 = scmp.lt.u32.totalorder %s2207_s28, %s2934_s3 }
   0x5   :  { %p2213_p2 = pnand %p2211_p1, %p2208_p0 }
   0x7   :  { %2216 = shalt.err (!%p2213_p2)
}
   0x8   :  { %s2217_s10 = scalar_lea.vmem %s26_s25, 8192  ;;  %p2222_p4 = scmp.lt.s32.totalorder %s26_s25, %s26_s25 }
   0x9   :  { %p2218_p3 = scmp.ne.s32.totalorder %s26_s25, %s2217_s10  ;;  %p2223_p5 = scmp.lt.s32.totalorder %s2217_s10, %s2217_s10 }
   0xb   :  { %p2224_p6 = por %p2223_p5, %p2222_p4 }
   0xd   :  { %p2225_p7 = pnand %p2224_p6, %p2218_p3 }
   0xf   :  { %2228 = shalt.err (!%p2225_p7)
}
  0x10   :  { %s2256_s11 = smov 128   ;;  %s2257_s12 = smov 8  }
  0x11   :  { %31 = dma.hbm_to_vmem [thread:$0]  %s2934_s3, 8192, %s26_s25, [#allocation3], %s2256_s11, %s2256_s11, %s2257_s12  }
  0x12   :  { %2251 = dma.done.wait [#allocation3], 8192  }
  0x13   :  { %2252 = vsyncadd [#allocation3], 4294959104  ;;  %v2258_v0 = vmov 0   ;;  %v2089_v1 = vld [vmem:[%s2932_s1 + $0x4] ss:$16 sps:$4 sm:$0xff]   ;;  %v43_v6 = vld [vmem:[%s2931_s0 + $0x8] sm:$0xff] }
  0x14   :  { %198 = vmatprep.mubr.bf16.mxu0 %v2258_v0  ;;  %359 = vmatprep.mubr.bf16.mxu1 %v2258_v0  ;;  %v2091_v2 = vld [vmem:[%s2932_s1] ss:$16 sps:$4 sm:$0xff]   ;;  %v2092_v3 = vld [vmem:[%s2932_s1 + $0xc] ss:$16 sps:$4 sm:$0xff]   ;;  %v2094_v4 = vld [vmem:[%s2932_s1 + $0x8] ss:$16 sps:$4 sm:$0xff]  }
  0x15   :  { %166 = vmatprep.subr.bf16.mxu0 %v2089_v1  ;;  %v42_v5 = vld [vmem:[%s2931_s0] sm:$0xff]  ;;  %vm126_vm0 = vcmask 130048   ;;  %327 = vmatprep.subr.bf16.mxu1 %v2092_v3  ;;  %v44_v8 = vld [vmem:[%s2931_s0 + $0x10] sm:$0xff]  ;;  %v45_v9 = vld [vmem:[%s2931_s0 + $0x18] sm:$0xff] }
  0x16   :  { %167 = vmatpush1.bf16.msra.mxu0 %v2091_v2  ;;  %v67_v7 = vpack.c.bf16 %v43_v6, %v42_v5  ;;  %328 = vmatpush1.bf16.msra.mxu1 %v2094_v4  ;;  %v68_v10 = vpack.c.bf16 %v45_v9, %v44_v8  ;;  %v2095_v11 = vld [vmem:[#allocation2] ss:$8 sps:$4 sm:$0xff]   ;;  %v2097_v12 = vld [vmem:[#allocation2 + $0x4] ss:$8 sps:$4 sm:$0xff]   ;;  %v2100_v13 = vld [vmem:[#allocation2 + $0x14] ss:$8 sps:$4 sm:$0xff]  }
  0x17   :  { %v46_v14 = vld [vmem:[%s2931_s0 + $0x20] sm:$0xff]  ;;  %v47_v15 = vld [vmem:[%s2931_s0 + $0x28] sm:$0xff]  ;;  %1036 = vmatprep.subr.bf16.mxu0 %v2097_v12  ;;  %v2098_v16 = vld [vmem:[#allocation2 + $0x10] ss:$8 sps:$4 sm:$0xff]  }
  0x18   :  { %v2103_v17 = vld [vmem:[#allocation2 + $0x24] ss:$8 sps:$4 sm:$0xff]   ;;  %v69_v18 = vpack.c.bf16 %v47_v15, %v46_v14  ;;  %v2101_v19 = vld [vmem:[#allocation2 + $0x20] ss:$8 sps:$4 sm:$0xff]   ;;  %v2106_v20 = vld [vmem:[#allocation2 + $0x34] ss:$8 sps:$4 sm:$0xff]  }
  0x19   :  { %1751 = vmatmul.mubr.msk.bf16.vlgmr.msra.gmra.mrb[0].mxu0 %vm126_vm0, %v67_v7  ;;  %1764 = vmatmul.mubr.msk.bf16.vlgmr.msra.gmra.mrb[0].mxu1 %vm126_vm0, %v67_v7  ;;  %v48_v21 = vld [vmem:[%s2931_s0 + $0x30] sm:$0xff]  ;;  %v49_v22 = vld [vmem:[%s2931_s0 + $0x38] sm:$0xff]  ;;  %v2109_v24 = vld [vmem:[#allocation2 + $0x44] ss:$8 sps:$4 sm:$0xff]  }
  0x1a   :  { %208 = vmatprep.mubr.bf16.mxu0 %v2258_v0  ;;  %369 = vmatprep.mubr.bf16.mxu1 %v2258_v0  ;;  %v2104_v23 = vld [vmem:[#allocation2 + $0x30] ss:$8 sps:$4 sm:$0xff]   ;;  %v70_v25 = vpack.c.bf16 %v49_v22, %v48_v21  ;;  %v2107_v26 = vld [vmem:[#allocation2 + $0x40] ss:$8 sps:$4 sm:$0xff]   ;;  %v2112_v27 = vld [vmem:[#allocation2 + $0x54] ss:$8 sps:$4 sm:$0xff]  }
  0x1b   :  { %1037 = vmatpush1.bf16.msra.mxu0 %v2095_v11  ;;  %v50_v28 = vld [vmem:[%s2931_s0 + $0x40] sm:$0xff]  ;;  %v51_v29 = vld [vmem:[%s2931_s0 + $0x48] sm:$0xff]  ;;  %v2110_v30 = vld [vmem:[#allocation2 + $0x50] ss:$8 sps:$4 sm:$0xff]  }
  0x1c   :  { %1038 = vmatprep.subr.bf16.mxu0 %v2100_v13  ;;  %v2115_v31 = vld [vmem:[#allocation2 + $0x64] ss:$8 sps:$4 sm:$0xff]   ;;  %v2113_v32 = vld [vmem:[#allocation2 + $0x60] ss:$8 sps:$4 sm:$0xff]   ;;  %v71_v33 = vpack.c.bf16 %v51_v29, %v50_v28  ;;  %v2118_v34 = vld [vmem:[#allocation2 + $0x74] ss:$8 sps:$4 sm:$0xff]  }
  0x1d   :  { %v52_v35 = vld [vmem:[%s2931_s0 + $0x50] sm:$0xff]  ;;  %v53_v36 = vld [vmem:[%s2931_s0 + $0x58] sm:$0xff]  ;;  %v2121_v38 = vld [vmem:[#allocation2 + $0x84] ss:$8 sps:$4 sm:$0xff]  }
  0x1e   :  { %v2116_v37 = vld [vmem:[#allocation2 + $0x70] ss:$8 sps:$4 sm:$0xff]   ;;  %v2119_v39 = vld [vmem:[#allocation2 + $0x80] ss:$8 sps:$4 sm:$0xff]   ;;  %v72_v40 = vpack.c.bf16 %v53_v36, %v52_v35  ;;  %v2124_v41 = vld [vmem:[#allocation2 + $0x94] ss:$8 sps:$4 sm:$0xff]  }
  0x1f   :  { %1039 = vmatpush1.bf16.msra.mxu0 %v2098_v16  ;;  %v54_v42 = vld [vmem:[%s2931_s0 + $0x60] sm:$0xff]  ;;  %v55_v43 = vld [vmem:[%s2931_s0 + $0x68] sm:$0xff]  ;;  %v2122_v44 = vld [vmem:[#allocation2 + $0x90] ss:$8 sps:$4 sm:$0xff]  }
  0x20   :  { %1040 = vmatprep.subr.bf16.mxu0 %v2103_v17  ;;  %v2127_v45 = vld [vmem:[#allocation2 + $0xa4] ss:$8 sps:$4 sm:$0xff]   ;;  %v2125_v46 = vld [vmem:[#allocation2 + $0xa0] ss:$8 sps:$4 sm:$0xff]   ;;  %v73_v47 = vpack.c.bf16 %v55_v43, %v54_v42  ;;  %v2130_v48 = vld [vmem:[#allocation2 + $0xb4] ss:$8 sps:$4 sm:$0xff]   ;;  %v86_v43 = vlaneseq }
  0x21   :  { %1752 = vmatmul.mubr.msk.bf16.gmra.mrb[4].mxu0 %vm126_vm0, %v68_v10  ;;  %1765 = vmatmul.mubr.msk.bf16.gmra.mrb[4].mxu1 %vm126_vm0, %v68_v10  ;;  %v56_v49 = vld [vmem:[%s2931_s0 + $0x70] sm:$0xff]  ;;  %v57_v50 = vld [vmem:[%s2931_s0 + $0x78] sm:$0xff]  ;;  %v2133_v52 = vld [vmem:[#allocation2 + $0xc4] ss:$8 sps:$4 sm:$0xff]  }
  0x22   :  { %218 = vmatprep.mubr.bf16.mxu0 %v2258_v0  ;;  %379 = vmatprep.mubr.bf16.mxu1 %v2258_v0  ;;  %v2128_v51 = vld [vmem:[#allocation2 + $0xb0] ss:$8 sps:$4 sm:$0xff]   ;;  %v74_v53 = vpack.c.bf16 %v57_v50, %v56_v49  ;;  %v2131_v54 = vld [vmem:[#allocation2 + $0xc0] ss:$8 sps:$4 sm:$0xff]   ;;  %v2136_v55 = vld [vmem:[#allocation2 + $0xd4] ss:$8 sps:$4 sm:$0xff]  }
  0x23   :  { %1041 = vmatpush1.bf16.msra.mxu0 %v2101_v19  ;;  %v58_v56 = vld [vmem:[%s2931_s0 + $0x80] sm:$0xff]  ;;  %v59_v57 = vld [vmem:[%s2931_s0 + $0x88] sm:$0xff]  ;;  %v2134_v58 = vld [vmem:[#allocation2 + $0xd0] ss:$8 sps:$4 sm:$0xff]  }
  0x24   :  { %1042 = vmatprep.subr.bf16.mxu0 %v2106_v20  ;;  %v2139_v59 = vld [vmem:[#allocation2 + $0xe4] ss:$8 sps:$4 sm:$0xff]   ;;  %v75_v60 = vpack.c.bf16 %v59_v57, %v58_v56  ;;  %v2137_v61 = vld [vmem:[#allocation2 + $0xe0] ss:$8 sps:$4 sm:$0xff]   ;;  %v60_v62 = vld [vmem:[%s2931_s0 + $0x90] sm:$0xff] }
  0x25   :  { %v61_v63 = vld [vmem:[%s2931_s0 + $0x98] sm:$0xff]  ;;  %v62_v2 = vld [vmem:[%s2931_s0 + $0xa0] sm:$0xff]  ;;  %v63_v3 = vld [vmem:[%s2931_s0 + $0xa8] sm:$0xff] }
  0x26   :  { %v76_v1 = vpack.c.bf16 %v61_v63, %v60_v62  ;;  %v77_v4 = vpack.c.bf16 %v63_v3, %v62_v2  ;;  %v64_v5 = vld [vmem:[%s2931_s0 + $0xb0] sm:$0xff]  ;;  %v65_v6 = vld [vmem:[%s2931_s0 + $0xb8] sm:$0xff]  ;;  %v2145_v8 = vld [vmem:[#allocation2 + $0x104] ss:$8 sps:$4 sm:$0xff]  }
  0x27   :  { %1043 = vmatpush1.bf16.msra.mxu0 %v2104_v23  ;;  %v78_v7 = vpack.c.bf16 %v65_v6, %v64_v5  ;;  %v2445_v9 = vld [vmem:[#allocation2 + $0x100] ss:$8 sps:$4 sm:$0xff]   ;;  %v2142_v10 = vld [vmem:[#allocation2 + $0xf4] ss:$8 sps:$4 sm:$0xff]   ;;  %1952 = vmatprep.subr.bf16.mxu1 %v2145_v8  ;;  %v2140_v12 = vld [vmem:[#allocation2 + $0xf0] ss:$8 sps:$4 sm:$0xff]  }
  0x28   :  { %1044 = vmatprep.subr.bf16.mxu0 %v2109_v24  ;;  %v66_v11 = vld [vmem:[%s2931_s0 + $0xc0] sm:$0xff]  ;;  %1968 = vmatpush1.bf16.msra.mxu1 %v2445_v9  ;;  %v2454_v13 = vld [vmem:[#allocation2 + $0x114] ss:$8 sps:$4 sm:$0xff]   ;;  %v2457_v14 = vld [vmem:[#allocation2 + $0x110] ss:$8 sps:$4 sm:$0xff]  }
  0x29   :  { %1753 = vmatmul.mubr.msk.bf16.gmra.mrb[8].mxu0 %vm126_vm0, %v69_v18  ;;  %1766 = vmatmul.mubr.msk.bf16.gmra.mrb[8].mxu1 %vm126_vm0, %v69_v18  ;;  %v79_v15 = vpack.c.bf16 %v66_v11, %v66_v11  ;;  %v2461_v16 = vld [vmem:[#allocation2 + $0x124] ss:$8 sps:$4 sm:$0xff]   ;;  %v2463_v17 = vld [vmem:[#allocation2 + $0x120] ss:$8 sps:$4 sm:$0xff]   ;;  %v2471_v18 = vld [vmem:[#allocation2 + $0x130] ss:$8 sps:$4 sm:$0xff]  }
  0x2a   :  { %228 = vmatprep.mubr.bf16.mxu0 %v2258_v0  ;;  %389 = vmatprep.mubr.bf16.mxu1 %v2258_v0  ;;  %v2475_v19 = vld [vmem:[#allocation2 + $0x144] ss:$8 sps:$4 sm:$0xff]   ;;  %v2477_v20 = vld [vmem:[#allocation2 + $0x140] ss:$8 sps:$4 sm:$0xff]   ;;  %v2481_v21 = vld [vmem:[#allocation2 + $0x154] ss:$8 sps:$4 sm:$0xff]  }
  0x2b   :  { %1045 = vmatpush1.bf16.msra.mxu0 %v2107_v26  ;;  %1953 = vmatprep.subr.bf16.mxu1 %v2454_v13  ;;  %v2483_v22 = vld [vmem:[#allocation2 + $0x150] ss:$8 sps:$4 sm:$0xff]   ;;  %v2487_v23 = vld [vmem:[#allocation2 + $0x164] ss:$8 sps:$4 sm:$0xff]   ;;  %v2489_v24 = vld [vmem:[#allocation2 + $0x160] ss:$8 sps:$4 sm:$0xff]  }
  0x2c   :  { %1046 = vmatprep.subr.bf16.mxu0 %v2112_v27  ;;  %1969 = vmatpush1.bf16.msra.mxu1 %v2457_v14  ;;  %v2495_v26 = vld [vmem:[#allocation2 + $0x170] ss:$8 sps:$4 sm:$0xff]   ;;  %v2499_v27 = vld [vmem:[#allocation2 + $0x184] ss:$8 sps:$4 sm:$0xff]   ;;  %v2501_v28 = vld [vmem:[#allocation2 + $0x180] ss:$8 sps:$4 sm:$0xff]  }
  0x2d   :  { %1954 = vmatprep.subr.bf16.mxu1 %v2461_v16  ;;  %v2505_v29 = vld [vmem:[#allocation2 + $0x194] ss:$8 sps:$4 sm:$0xff]   ;;  %v2523_v35 = vld [vmem:[#allocation2 + $0x1c4] ss:$8 sps:$4 sm:$0xff]   ;;  %v2525_v36 = vld [vmem:[#allocation2 + $0x1c0] ss:$8 sps:$4 sm:$0xff]  }
  0x2e   :  { %v2543_v42 = vld [vmem:[#allocation2 + $0x1f0] ss:$8 sps:$4 sm:$0xff]  }
  0x2f   :  { %1047 = vmatpush1.bf16.msra.mxu0 %v2110_v30  ;;  %v2507_v30 = vld [vmem:[#allocation2 + $0x190] ss:$8 sps:$4 sm:$0xff]  }
  0x30   :  { %1048 = vmatprep.subr.bf16.mxu0 %v2115_v31  ;;  %1970 = vmatpush1.bf16.msra.mxu1 %v2463_v17  ;;  %v2511_v31 = vld [vmem:[#allocation2 + $0x1a4] ss:$8 sps:$4 sm:$0xff]  }
  0x31   :  { %1754 = vmatmul.mubr.msk.bf16.gmra.mrb[12].mxu0 %vm126_vm0, %v70_v25  ;;  %1767 = vmatmul.mubr.msk.bf16.gmra.mrb[12].mxu1 %vm126_vm0, %v70_v25  ;;  %v2493_v25 = vld [vmem:[#allocation2 + $0x174] ss:$8 sps:$4 sm:$0xff]  }
  0x32   :  { %238 = vmatprep.mubr.bf16.mxu0 %v2258_v0  ;;  %399 = vmatprep.mubr.bf16.mxu1 %v2258_v0 }
  0x33   :  { %1049 = vmatpush1.bf16.msra.mxu0 %v2113_v32  ;;  %v2513_v32 = vld [vmem:[#allocation2 + $0x1a0] ss:$8 sps:$4 sm:$0xff]  }
  0x34   :  { %1050 = vmatprep.subr.bf16.mxu0 %v2118_v34  ;;  %v2519_v34 = vld [vmem:[#allocation2 + $0x1b0] ss:$8 sps:$4 sm:$0xff]  }
  0x37   :  { %1051 = vmatpush1.bf16.msra.mxu0 %v2116_v37  ;;  %v2529_v37 = vld [vmem:[#allocation2 + $0x1d4] ss:$8 sps:$4 sm:$0xff]  }
  0x38   :  { %1052 = vmatprep.subr.bf16.mxu0 %v2121_v38  ;;  %v2531_v38 = vld [vmem:[#allocation2 + $0x1d0] ss:$8 sps:$4 sm:$0xff]  }
  0x39   :  { %1755 = vmatmul.mubr.msk.bf16.gmra.mrb[16].mxu0 %vm126_vm0, %v71_v33  ;;  %1768 = vmatmul.mubr.msk.bf16.gmra.mrb[16].mxu1 %vm126_vm0, %v71_v33  ;;  %v2517_v33 = vld [vmem:[#allocation2 + $0x1b4] ss:$8 sps:$4 sm:$0xff]  }
  0x3a   :  { %248 = vmatprep.mubr.bf16.mxu0 %v2258_v0  ;;  %409 = vmatprep.mubr.bf16.mxu1 %v2258_v0 }
  0x3b   :  { %1053 = vmatpush1.bf16.msra.mxu0 %v2119_v39  ;;  %v2535_v39 = vld [vmem:[#allocation2 + $0x1e4] ss:$8 sps:$4 sm:$0xff]  }
  0x3c   :  { %1054 = vmatprep.subr.bf16.mxu0 %v2124_v41  ;;  %v2541_v41 = vld [vmem:[#allocation2 + $0x1f4] ss:$8 sps:$4 sm:$0xff]  }
  0x3f   :  { %1055 = vmatpush1.bf16.msra.mxu0 %v2122_v44  ;;  %v2547_v44 = vshrl.u32 %v86_v43, 7 }
  0x40   :  { %1056 = vmatprep.subr.bf16.mxu0 %v2127_v45 }
  0x41   :  { %1756 = vmatmul.mubr.msk.bf16.gmra.mrb[20].mxu0 %vm126_vm0, %v72_v40  ;;  %1769 = vmatmul.mubr.msk.bf16.gmra.mrb[20].mxu1 %vm126_vm0, %v72_v40  ;;  %v2537_v40 = vld [vmem:[#allocation2 + $0x1e0] ss:$8 sps:$4 sm:$0xff]   ;;  %v88_v45 = vsub.s32 0, %v2547_v44  ;;  %v96_v49 = vsub.s32 2, %v2547_v44 }
  0x42   :  { %258 = vmatprep.mubr.bf16.mxu0 %v2258_v0  ;;  %419 = vmatprep.mubr.bf16.mxu1 %v2258_v0 }
  0x43   :  { %1057 = vmatpush1.bf16.msra.mxu0 %v2125_v46  ;;  %v84_v46 = vld [vmem:[%s2933_s2] sm:$0xf] }
  0x44   :  { %1058 = vmatprep.subr.bf16.mxu0 %v2130_v48  ;;  %v2556_v48 = vrot.slane %v84_v46, %v88_v45 }
  0x47   :  { %1059 = vmatpush1.bf16.msra.mxu0 %v2128_v51  ;;  %v100_v51 = vsub.s32 3, %v2547_v44 }
  0x48   :  { %1060 = vmatprep.subr.bf16.mxu0 %v2133_v52 }
  0x49   :  { %1757 = vmatmul.mubr.msk.bf16.gmra.mrb[24].mxu0 %vm126_vm0, %v73_v47  ;;  %1770 = vmatmul.mubr.msk.bf16.gmra.mrb[24].mxu1 %vm126_vm0, %v73_v47  ;;  %v92_v47 = vsub.s32 1, %v2547_v44 }
  0x4a   :  { %268 = vmatprep.mubr.bf16.mxu0 %v2258_v0  ;;  %429 = vmatprep.mubr.bf16.mxu1 %v2258_v0 }
  0x4b   :  { %1061 = vmatpush1.bf16.msra.mxu0 %v2131_v54  ;;  %v2561_v50 = vrot.slane %v84_v46, %v92_v47 }
  0x4c   :  { %1062 = vmatprep.subr.bf16.mxu0 %v2136_v55  ;;  %v2565_v55 = vrot.slane %v84_v46, %v96_v49 }
  0x4f   :  { %1063 = vmatpush1.bf16.msra.mxu0 %v2134_v58 }
  0x50   :  { %1064 = vmatprep.subr.bf16.mxu0 %v2139_v59  ;;  %v2568_v59 = vrot.slane %v84_v46, %v100_v51 }
  0x51   :  { %1758 = vmatmul.mubr.msk.bf16.gmra.mrb[28].mxu0 %vm126_vm0, %v74_v53  ;;  %1771 = vmatmul.mubr.msk.bf16.gmra.mrb[28].mxu1 %vm126_vm0, %v74_v53 }
  0x52   :  { %278 = vmatprep.mubr.bf16.mxu0 %v2258_v0  ;;  %439 = vmatprep.mubr.bf16.mxu1 %v2258_v0 }
  0x53   :  { %1065 = vmatpush1.bf16.msra.mxu0 %v2137_v61 }
  0x54   :  { %1066 = vmatprep.subr.bf16.mxu0 %v2142_v10 }
  0x57   :  { %1067 = vmatpush1.bf16.msra.mxu0 %v2140_v12 }
  0x58   :  { %1197 = vmatprep.subr.bf16.mxu0 %v2145_v8 }
  0x59   :  { %1759 = vmatmul.mubr.msk.bf16.gmra.mrb[32].mxu0 %vm126_vm0, %v75_v60  ;;  %1772 = vmatmul.mubr.msk.bf16.gmra.mrb[32].mxu1 %vm126_vm0, %v75_v60 }
  0x5a   :  { %288 = vmatprep.mubr.bf16.mxu0 %v2258_v0  ;;  %449 = vmatprep.mubr.bf16.mxu1 %v2258_v0 }
  0x61   :  { %1760 = vmatmul.mubr.msk.bf16.gmra.mrb[36].mxu0 %vm126_vm0, %v76_v1  ;;  %1773 = vmatmul.mubr.msk.bf16.gmra.mrb[36].mxu1 %vm126_vm0, %v76_v1 }
  0x62   :  { %298 = vmatprep.mubr.bf16.mxu0 %v2258_v0  ;;  %459 = vmatprep.mubr.bf16.mxu1 %v2258_v0 }
  0x69   :  { %1761 = vmatmul.mubr.msk.bf16.gmra.mrb[40].mxu0 %vm126_vm0, %v77_v4  ;;  %1774 = vmatmul.mubr.msk.bf16.gmra.mrb[40].mxu1 %vm126_vm0, %v77_v4 }
  0x6a   :  { %308 = vmatprep.mubr.bf16.mxu0 %v2258_v0  ;;  %469 = vmatprep.mubr.bf16.mxu1 %v2258_v0 }
  0x71   :  { %1762 = vmatmul.mubr.msk.bf16.gmra.mrb[44].mxu0 %vm126_vm0, %v78_v7  ;;  %1775 = vmatmul.mubr.msk.bf16.gmra.mrb[44].mxu1 %vm126_vm0, %v78_v7 }
  0x72   :  { %318 = vmatprep.mubr.bf16.mxu0 %v2258_v0  ;;  %479 = vmatprep.mubr.bf16.mxu1 %v2258_v0  ;;  %v2469_v0 = vld [vmem:[#allocation2 + $0x134] ss:$8 sps:$4 sm:$0xff]  }
  0x73   :  { %1955 = vmatprep.subr.bf16.mxu1 %v2469_v0 }
  0x74   :  { %1971 = vmatpush1.bf16.msra.mxu1 %v2471_v18 }
  0x75   :  { %1956 = vmatprep.subr.bf16.mxu1 %v2475_v19 }
  0x78   :  { %1972 = vmatpush1.bf16.msra.mxu1 %v2477_v20 }
  0x79   :  { %1763 = vmatmul.mubr.msk.bf16.gmra.mrb[48].mxu0 %vm126_vm0, %v79_v15  ;;  %1776 = vmatmul.mubr.msk.bf16.gmra.mrb[48].mxu1 %vm126_vm0, %v79_v15 }
  0x7a   :  { %1957 = vmatprep.subr.bf16.mxu1 %v2481_v21 }
  0x7c   :  { %1973 = vmatpush1.bf16.msra.mxu1 %v2483_v22 }
  0x7d   :  { %1958 = vmatprep.subr.bf16.mxu1 %v2487_v23 }
  0x80   :  { %1974 = vmatpush1.bf16.msra.mxu1 %v2489_v24 }
  0x81   :  { %1959 = vmatprep.subr.bf16.mxu1 %v2493_v25 }
  0x84   :  { %1975 = vmatpush1.bf16.msra.mxu1 %v2495_v26 }
  0x85   :  { %1960 = vmatprep.subr.bf16.mxu1 %v2499_v27 }
  0x88   :  { %1976 = vmatpush1.bf16.msra.mxu1 %v2501_v28 }
  0x89   :  { %1961 = vmatprep.subr.bf16.mxu1 %v2505_v29 }
  0x8c   :  { %1977 = vmatpush1.bf16.msra.mxu1 %v2507_v30 }
  0x8d   :  { %1962 = vmatprep.subr.bf16.mxu1 %v2511_v31 }
  0x90   :  { %1978 = vmatpush1.bf16.msra.mxu1 %v2513_v32 }
  0x91   :  { %1963 = vmatprep.subr.bf16.mxu1 %v2517_v33 }
  0x94   :  { %1979 = vmatpush1.bf16.msra.mxu1 %v2519_v34 }
  0x95   :  { %1964 = vmatprep.subr.bf16.mxu1 %v2523_v35 }
  0x98   :  { %1980 = vmatpush1.bf16.msra.mxu1 %v2525_v36 }
  0x99   :  { %1965 = vmatprep.subr.bf16.mxu1 %v2529_v37 }
  0x9c   :  { %1981 = vmatpush1.bf16.msra.mxu1 %v2531_v38 }
  0x9d   :  { %1966 = vmatprep.subr.bf16.mxu1 %v2535_v39 }
  0xa0   :  { %1982 = vmatpush1.bf16.msra.mxu1 %v2537_v40 }
  0xa1   :  { %1967 = vmatprep.subr.bf16.mxu1 %v2541_v41 }
  0xa4   :  { %1983 = vmatpush1.bf16.msra.mxu1 %v2543_v42 }
  0xec   :  { %v200_v52 = vpop.f32.mrb[0].mxu0  ;;  %v361_v58 = vpop.f32.mrb[0].mxu1 }
  0xed   :  { %v201_v53 = vadd.f32 %v200_v52, %v2556_v48  ;;  %v202_v54 = vpop.f32.mrb[1].mxu0  ;;  %v362_v62 = vadd.f32 %v361_v58, %v2565_v55  ;;  %v363_v63 = vpop.f32.mrb[1].mxu1 }
  0xee   :  { %v203_v56 = vadd.f32 %v202_v54, %v2561_v50  ;;  %v204_v57 = vpop.f32.mrb[2].mxu0  ;;  %v364_v2 = vadd.f32 %v363_v63, %v2568_v59  ;;  %v365_v3 = vpop.f32.mrb[2].mxu1 }
  0xef   :  { %v205_v60 = vadd.f32 %v204_v57, %v2556_v48  ;;  %v206_v61 = vpop.f32.mrb[3].mxu0  ;;  %v488_v4 = vmax.f32 %v201_v53, 0.0  ;;  %v490_v6 = vmax.f32 %v362_v62, 0.0  ;;  %v366_v7 = vadd.f32 %v365_v3, %v2565_v55  ;;  %v367_v8 = vpop.f32.mrb[3].mxu1 }
  0xf0   :  { %v207_v1 = vadd.f32 %v206_v61, %v2561_v50  ;;  %v489_v10 = vmax.f32 %v203_v56, 0.0  ;;  %v491_v12 = vmax.f32 %v364_v2, 0.0  ;;  %v368_v15 = vadd.f32 %v367_v8, %v2568_v59 }
  0xf1   :  { %v492_v5 = vmax.f32 %v205_v60, 0.0  ;;  %v494_v46 = vmax.f32 %v366_v7, 0.0 }
  0xf2   :  { %v493_v11 = vmax.f32 %v207_v1, 0.0  ;;  %v495_v52 = vmax.f32 %v368_v15, 0.0 }
  0xf3   :  { %v588_v43 = vpack.c.bf16 %v492_v5, %v488_v4  ;;  %v2577_v58 = vpack.c.bf16 %v494_v46, %v490_v6 }
  0xf4   :  { %v589_v49 = vpack.c.bf16 %v493_v11, %v489_v10  ;;  %v210_v51 = vpop.f32.mrb[4].mxu0  ;;  %v2580_v61 = vpack.c.bf16 %v495_v52, %v491_v12  ;;  %v371_v56 = vpop.f32.mrb[4].mxu1 }
  0xf5   :  { %v211_v54 = vadd.f32 %v210_v51, %v2556_v48  ;;  %v212_v57 = vpop.f32.mrb[5].mxu0  ;;  %v372_v1 = vadd.f32 %v371_v56, %v2565_v55  ;;  %v373_v2 = vpop.f32.mrb[5].mxu1 }
  0xf6   :  { %v213_v53 = vadd.f32 %v212_v57, %v2561_v50  ;;  %v214_v60 = vpop.f32.mrb[6].mxu0  ;;  %1068 = vmatprep.mubr.bf16.mxu0 %v589_v49  ;;  %v374_v4 = vadd.f32 %v373_v2, %v2568_v59  ;;  %v375_v5 = vpop.f32.mrb[6].mxu1 }
  0xf7   :  { %v215_v62 = vadd.f32 %v214_v60, %v2556_v48  ;;  %v216_v63 = vpop.f32.mrb[7].mxu0  ;;  %1069 = vmatmul.mubr.bf16.vlgmr.msra.gmra.mrb[52].mxu0 %v588_v43  ;;  %v496_v6 = vmax.f32 %v211_v54, 0.0  ;;  %v498_v8 = vmax.f32 %v372_v1, 0.0  ;;  %v376_v10 = vadd.f32 %v375_v5, %v2565_v55  ;;  %v377_v11 = vpop.f32.mrb[7].mxu1 }
  0xf8   :  { %v217_v3 = vadd.f32 %v216_v63, %v2561_v50  ;;  %1198 = vmatpush1.bf16.msra.mxu0 %v2445_v9  ;;  %v497_v12 = vmax.f32 %v213_v53, 0.0  ;;  %v499_v43 = vmax.f32 %v374_v4, 0.0  ;;  %v378_v46 = vadd.f32 %v377_v11, %v2568_v59 }
  0xf9   :  { %v500_v7 = vmax.f32 %v215_v62, 0.0  ;;  %1199 = vmatprep.subr.bf16.mxu0 %v2454_v13  ;;  %v502_v51 = vmax.f32 %v376_v10, 0.0 }
  0xfa   :  { %v501_v15 = vmax.f32 %v217_v3, 0.0  ;;  %v503_v57 = vmax.f32 %v378_v46, 0.0 }
  0xfb   :  { %v592_v49 = vpack.c.bf16 %v500_v7, %v496_v6  ;;  %v2593_v13 = vpack.c.bf16 %v502_v51, %v498_v8 }
  0xfc   :  { %v593_v52 = vpack.c.bf16 %v501_v15, %v497_v12  ;;  %v220_v9 = vpop.f32.mrb[8].mxu0  ;;  %1200 = vmatpush1.bf16.msra.mxu0 %v2457_v14  ;;  %v2596_v62 = vpack.c.bf16 %v503_v57, %v499_v43  ;;  %v381_v63 = vpop.f32.mrb[8].mxu1 }
  0xfd   :  { %v221_v54 = vadd.f32 %v220_v9, %v2556_v48  ;;  %v222_v60 = vpop.f32.mrb[9].mxu0  ;;  %1201 = vmatprep.subr.bf16.mxu0 %v2461_v16  ;;  %v382_v14 = vadd.f32 %v381_v63, %v2565_v55  ;;  %v383_v3 = vpop.f32.mrb[9].mxu1 }
  0xfe   :  { %v223_v53 = vadd.f32 %v222_v60, %v2561_v50  ;;  %v224_v56 = vpop.f32.mrb[10].mxu0  ;;  %1078 = vmatprep.mubr.bf16.mxu0 %v593_v52  ;;  %v384_v16 = vadd.f32 %v383_v3, %v2568_v59  ;;  %v385_v5 = vpop.f32.mrb[10].mxu1 }
  0xff   :  { %v225_v1 = vadd.f32 %v224_v56, %v2556_v48  ;;  %v226_v2 = vpop.f32.mrb[11].mxu0  ;;  %1079 = vmatmul.mubr.bf16.gmra.mrb[56].mxu0 %v592_v49  ;;  %v504_v6 = vmax.f32 %v221_v54, 0.0  ;;  %v506_v8 = vmax.f32 %v382_v14, 0.0  ;;  %v386_v10 = vadd.f32 %v385_v5, %v2565_v55  ;;  %v387_v11 = vpop.f32.mrb[11].mxu1 }
 0x100   :  { %v227_v4 = vadd.f32 %v226_v2, %v2561_v50  ;;  %1202 = vmatpush1.bf16.msra.mxu0 %v2463_v17  ;;  %v505_v12 = vmax.f32 %v223_v53, 0.0  ;;  %v507_v43 = vmax.f32 %v384_v16, 0.0  ;;  %v388_v46 = vadd.f32 %v387_v11, %v2568_v59 }
 0x101   :  { %v508_v7 = vmax.f32 %v225_v1, 0.0  ;;  %1203 = vmatprep.subr.bf16.mxu0 %v2469_v0  ;;  %v510_v51 = vmax.f32 %v386_v10, 0.0 }
 0x102   :  { %v509_v15 = vmax.f32 %v227_v4, 0.0  ;;  %v511_v9 = vmax.f32 %v388_v46, 0.0 }
 0x103   :  { %v596_v49 = vpack.c.bf16 %v508_v7, %v504_v6  ;;  %v2609_v0 = vpack.c.bf16 %v510_v51, %v506_v8 }
 0x104   :  { %v597_v52 = vpack.c.bf16 %v509_v15, %v505_v12  ;;  %v230_v17 = vpop.f32.mrb[12].mxu0  ;;  %1204 = vmatpush1.bf16.msra.mxu0 %v2471_v18  ;;  %v2612_v56 = vpack.c.bf16 %v511_v9, %v507_v43  ;;  %v391_v63 = vpop.f32.mrb[12].mxu1 }
 0x105   :  { %v231_v57 = vadd.f32 %v230_v17, %v2556_v48  ;;  %v232_v54 = vpop.f32.mrb[13].mxu0  ;;  %1205 = vmatprep.subr.bf16.mxu0 %v2475_v19  ;;  %v392_v18 = vadd.f32 %v391_v63, %v2565_v55  ;;  %v393_v14 = vpop.f32.mrb[13].mxu1 }
 0x106   :  { %v233_v60 = vadd.f32 %v232_v54, %v2561_v50  ;;  %v234_v53 = vpop.f32.mrb[14].mxu0  ;;  %1088 = vmatprep.mubr.bf16.mxu0 %v597_v52  ;;  %v394_v19 = vadd.f32 %v393_v14, %v2568_v59  ;;  %v395_v4 = vpop.f32.mrb[14].mxu1 }
 0x107   :  { %v235_v1 = vadd.f32 %v234_v53, %v2556_v48  ;;  %v236_v2 = vpop.f32.mrb[15].mxu0  ;;  %1089 = vmatmul.mubr.bf16.gmra.mrb[60].mxu0 %v596_v49  ;;  %v512_v16 = vmax.f32 %v231_v57, 0.0  ;;  %v514_v6 = vmax.f32 %v392_v18, 0.0  ;;  %v396_v7 = vadd.f32 %v395_v4, %v2565_v55  ;;  %v397_v8 = vpop.f32.mrb[15].mxu1 }
 0x108   :  { %v237_v3 = vadd.f32 %v236_v2, %v2561_v50  ;;  %1206 = vmatpush1.bf16.msra.mxu0 %v2477_v20  ;;  %v513_v10 = vmax.f32 %v233_v60, 0.0  ;;  %v515_v12 = vmax.f32 %v394_v19, 0.0  ;;  %v398_v15 = vadd.f32 %v397_v8, %v2568_v59 }
 0x109   :  { %v516_v5 = vmax.f32 %v235_v1, 0.0  ;;  %1207 = vmatprep.subr.bf16.mxu0 %v2481_v21  ;;  %v518_v46 = vmax.f32 %v396_v7, 0.0 }
 0x10a   :  { %v517_v11 = vmax.f32 %v237_v3, 0.0  ;;  %v519_v51 = vmax.f32 %v398_v15, 0.0 }
 0x10b   :  { %v600_v43 = vpack.c.bf16 %v516_v5, %v512_v16  ;;  %v2624_v9 = vpack.c.bf16 %v518_v46, %v514_v6 }
 0x10c   :  { %v601_v49 = vpack.c.bf16 %v517_v11, %v513_v10  ;;  %v240_v20 = vpop.f32.mrb[16].mxu0  ;;  %1208 = vmatpush1.bf16.msra.mxu0 %v2483_v22  ;;  %v2628_v54 = vpack.c.bf16 %v519_v51, %v515_v12  ;;  %v401_v60 = vpop.f32.mrb[16].mxu1 }
 0x10d   :  { %v241_v52 = vadd.f32 %v240_v20, %v2556_v48  ;;  %v242_v17 = vpop.f32.mrb[17].mxu0  ;;  %1209 = vmatprep.subr.bf16.mxu0 %v2487_v23  ;;  %v402_v22 = vadd.f32 %v401_v60, %v2565_v55  ;;  %v403_v1 = vpop.f32.mrb[17].mxu1 }
 0x10e   :  { %v243_v21 = vadd.f32 %v242_v17, %v2561_v50  ;;  %v244_v57 = vpop.f32.mrb[18].mxu0  ;;  %1098 = vmatprep.mubr.bf16.mxu0 %v601_v49  ;;  %v404_v18 = vadd.f32 %v403_v1, %v2568_v59  ;;  %v405_v14 = vpop.f32.mrb[18].mxu1 }
 0x10f   :  { %v245_v53 = vadd.f32 %v244_v57, %v2556_v48  ;;  %v246_v63 = vpop.f32.mrb[19].mxu0  ;;  %1099 = vmatmul.mubr.bf16.gmra.mrb[64].mxu0 %v600_v43  ;;  %v520_v23 = vmax.f32 %v241_v52, 0.0  ;;  %v522_v19 = vmax.f32 %v402_v22, 0.0  ;;  %v406_v4 = vadd.f32 %v405_v14, %v2565_v55  ;;  %v407_v16 = vpop.f32.mrb[19].mxu1 }
 0x110   :  { %v247_v2 = vadd.f32 %v246_v63, %v2561_v50  ;;  %1210 = vmatpush1.bf16.msra.mxu0 %v2489_v24  ;;  %v521_v5 = vmax.f32 %v243_v21, 0.0  ;;  %v523_v7 = vmax.f32 %v404_v18, 0.0  ;;  %v408_v8 = vadd.f32 %v407_v16, %v2568_v59 }
 0x111   :  { %v524_v3 = vmax.f32 %v245_v53, 0.0  ;;  %1211 = vmatprep.subr.bf16.mxu0 %v2493_v25  ;;  %v526_v11 = vmax.f32 %v406_v4, 0.0 }
 0x112   :  { %v525_v6 = vmax.f32 %v247_v2, 0.0  ;;  %v527_v43 = vmax.f32 %v408_v8, 0.0 }
 0x113   :  { %v604_v10 = vpack.c.bf16 %v524_v3, %v520_v23  ;;  %v2640_v49 = vpack.c.bf16 %v526_v11, %v522_v19 }
 0x114   :  { %v605_v12 = vpack.c.bf16 %v525_v6, %v521_v5  ;;  %v250_v15 = vpop.f32.mrb[20].mxu0  ;;  %1212 = vmatpush1.bf16.msra.mxu0 %v2495_v26  ;;  %v2644_v51 = vpack.c.bf16 %v527_v43, %v523_v7  ;;  %v411_v52 = vpop.f32.mrb[20].mxu1 }
 0x115   :  { %v251_v24 = vadd.f32 %v250_v15, %v2556_v48  ;;  %v252_v46 = vpop.f32.mrb[21].mxu0  ;;  %1213 = vmatprep.subr.bf16.mxu0 %v2499_v27  ;;  %v412_v26 = vadd.f32 %v411_v52, %v2565_v55  ;;  %v413_v57 = vpop.f32.mrb[21].mxu1 }
 0x116   :  { %v253_v25 = vadd.f32 %v252_v46, %v2561_v50  ;;  %v254_v20 = vpop.f32.mrb[22].mxu0  ;;  %1108 = vmatprep.mubr.bf16.mxu0 %v605_v12  ;;  %v414_v53 = vadd.f32 %v413_v57, %v2568_v59  ;;  %v415_v63 = vpop.f32.mrb[22].mxu1 }
 0x117   :  { %v255_v17 = vadd.f32 %v254_v20, %v2556_v48  ;;  %v256_v21 = vpop.f32.mrb[23].mxu0  ;;  %1109 = vmatmul.mubr.bf16.gmra.mrb[68].mxu0 %v604_v10  ;;  %v528_v27 = vmax.f32 %v251_v24, 0.0  ;;  %v530_v1 = vmax.f32 %v412_v26, 0.0  ;;  %v416_v2 = vadd.f32 %v415_v63, %v2565_v55  ;;  %v417_v18 = vpop.f32.mrb[23].mxu1 }
 0x118   :  { %v257_v60 = vadd.f32 %v256_v21, %v2561_v50  ;;  %1214 = vmatpush1.bf16.msra.mxu0 %v2501_v28  ;;  %v529_v14 = vmax.f32 %v253_v25, 0.0  ;;  %v531_v3 = vmax.f32 %v414_v53, 0.0  ;;  %v418_v19 = vadd.f32 %v417_v18, %v2568_v59 }
 0x119   :  { %v532_v22 = vmax.f32 %v255_v17, 0.0  ;;  %1215 = vmatprep.subr.bf16.mxu0 %v2505_v29  ;;  %v534_v16 = vmax.f32 %v416_v2, 0.0 }
 0x11a   :  { %v533_v23 = vmax.f32 %v257_v60, 0.0  ;;  %v535_v7 = vmax.f32 %v418_v19, 0.0 }
 0x11b   :  { %v608_v4 = vpack.c.bf16 %v532_v22, %v528_v27  ;;  %v2656_v10 = vpack.c.bf16 %v534_v16, %v530_v1 }
 0x11c   :  { %v609_v5 = vpack.c.bf16 %v533_v23, %v529_v14  ;;  %v260_v6 = vpop.f32.mrb[24].mxu0  ;;  %1216 = vmatpush1.bf16.msra.mxu0 %v2507_v30  ;;  %v2660_v12 = vpack.c.bf16 %v535_v7, %v531_v3  ;;  %v421_v15 = vpop.f32.mrb[24].mxu1 }
 0x11d   :  { %v261_v28 = vadd.f32 %v260_v6, %v2556_v48  ;;  %v262_v8 = vpop.f32.mrb[25].mxu0  ;;  %1217 = vmatprep.subr.bf16.mxu0 %v2511_v31  ;;  %v422_v30 = vadd.f32 %v421_v15, %v2565_v55  ;;  %v423_v46 = vpop.f32.mrb[25].mxu1 }
 0x11e   :  { %v263_v29 = vadd.f32 %v262_v8, %v2561_v50  ;;  %v264_v11 = vpop.f32.mrb[26].mxu0  ;;  %1118 = vmatprep.mubr.bf16.mxu0 %v609_v5  ;;  %v424_v20 = vadd.f32 %v423_v46, %v2568_v59  ;;  %v425_v52 = vpop.f32.mrb[26].mxu1 }
 0x11f   :  { %v265_v43 = vadd.f32 %v264_v11, %v2556_v48  ;;  %v266_v24 = vpop.f32.mrb[27].mxu0  ;;  %1119 = vmatmul.mubr.bf16.gmra.mrb[72].mxu0 %v608_v4  ;;  %v536_v31 = vmax.f32 %v261_v28, 0.0  ;;  %v538_v21 = vmax.f32 %v422_v30, 0.0  ;;  %v426_v26 = vadd.f32 %v425_v52, %v2565_v55  ;;  %v427_v57 = vpop.f32.mrb[27].mxu1 }
 0x120   :  { %v267_v25 = vadd.f32 %v266_v24, %v2561_v50  ;;  %1218 = vmatpush1.bf16.msra.mxu0 %v2513_v32  ;;  %v537_v60 = vmax.f32 %v263_v29, 0.0  ;;  %v539_v63 = vmax.f32 %v424_v20, 0.0  ;;  %v428_v27 = vadd.f32 %v427_v57, %v2568_v59 }
 0x121   :  { %v540_v17 = vmax.f32 %v265_v43, 0.0  ;;  %1219 = vmatprep.subr.bf16.mxu0 %v2517_v33  ;;  %v542_v1 = vmax.f32 %v426_v26, 0.0 }
 0x122   :  { %v541_v53 = vmax.f32 %v267_v25, 0.0  ;;  %v543_v14 = vmax.f32 %v428_v27, 0.0 }
 0x123   :  { %v612_v22 = vpack.c.bf16 %v540_v17, %v536_v31  ;;  %v2672_v23 = vpack.c.bf16 %v542_v1, %v538_v21 }
 0x124   :  { %v613_v2 = vpack.c.bf16 %v541_v53, %v537_v60  ;;  %v270_v18 = vpop.f32.mrb[28].mxu0  ;;  %1220 = vmatpush1.bf16.msra.mxu0 %v2519_v34  ;;  %v2676_v19 = vpack.c.bf16 %v543_v14, %v539_v63  ;;  %v431_v16 = vpop.f32.mrb[28].mxu1 }
 0x125   :  { %v271_v32 = vadd.f32 %v270_v18, %v2556_v48  ;;  %v272_v3 = vpop.f32.mrb[29].mxu0  ;;  %1221 = vmatprep.subr.bf16.mxu0 %v2523_v35  ;;  %v432_v6 = vadd.f32 %v431_v16, %v2565_v55  ;;  %v433_v34 = vpop.f32.mrb[29].mxu1 }
 0x126   :  { %v273_v33 = vadd.f32 %v272_v3, %v2561_v50  ;;  %v274_v4 = vpop.f32.mrb[30].mxu0  ;;  %1128 = vmatprep.mubr.bf16.mxu0 %v613_v2  ;;  %v434_v8 = vadd.f32 %v433_v34, %v2568_v59  ;;  %v435_v29 = vpop.f32.mrb[30].mxu1 }
 0x127   :  { %v275_v5 = vadd.f32 %v274_v4, %v2556_v48  ;;  %v276_v7 = vpop.f32.mrb[31].mxu0  ;;  %1129 = vmatmul.mubr.bf16.gmra.mrb[76].mxu0 %v612_v22  ;;  %v544_v35 = vmax.f32 %v271_v32, 0.0  ;;  %v546_v15 = vmax.f32 %v432_v6, 0.0  ;;  %v436_v43 = vadd.f32 %v435_v29, %v2565_v55  ;;  %v437_v24 = vpop.f32.mrb[31].mxu1 }
 0x128   :  { %v277_v28 = vadd.f32 %v276_v7, %v2561_v50  ;;  %1222 = vmatpush1.bf16.msra.mxu0 %v2525_v36  ;;  %v545_v30 = vmax.f32 %v273_v33, 0.0  ;;  %v547_v25 = vmax.f32 %v434_v8, 0.0  ;;  %v438_v20 = vadd.f32 %v437_v24, %v2568_v59 }
 0x129   :  { %v548_v11 = vmax.f32 %v275_v5, 0.0  ;;  %1223 = vmatprep.subr.bf16.mxu0 %v2529_v37  ;;  %v550_v31 = vmax.f32 %v436_v43, 0.0 }
 0x12a   :  { %v549_v46 = vmax.f32 %v277_v28, 0.0  ;;  %v551_v21 = vmax.f32 %v438_v20, 0.0 }
 0x12b   :  { %v616_v52 = vpack.c.bf16 %v548_v11, %v544_v35  ;;  %v618_v36 = vpack.c.bf16 %v550_v31, %v546_v15 }
 0x12c   :  { %v617_v17 = vpack.c.bf16 %v549_v46, %v545_v30  ;;  %v280_v26 = vpop.f32.mrb[32].mxu0  ;;  %1224 = vmatpush1.bf16.msra.mxu0 %v2531_v38  ;;  %v619_v53 = vpack.c.bf16 %v551_v21, %v547_v25  ;;  %v441_v27 = vpop.f32.mrb[32].mxu1 }
 0x12d   :  { %v281_v57 = vadd.f32 %v280_v26, %v2556_v48  ;;  %v282_v60 = vpop.f32.mrb[33].mxu0  ;;  %1225 = vmatprep.subr.bf16.mxu0 %v2535_v39  ;;  %v442_v1 = vadd.f32 %v441_v27, %v2565_v55  ;;  %v443_v18 = vpop.f32.mrb[33].mxu1 }
 0x12e   :  { %v283_v37 = vadd.f32 %v282_v60, %v2561_v50  ;;  %v284_v63 = vpop.f32.mrb[34].mxu0  ;;  %1138 = vmatprep.mubr.bf16.mxu0 %v617_v17  ;;  %v444_v14 = vadd.f32 %v443_v18, %v2568_v59  ;;  %v445_v32 = vpop.f32.mrb[34].mxu1  ;;  %1299 = vmatprep.mubr.bf16.mxu1 %v619_v53 }
 0x12f   :  { %v285_v22 = vadd.f32 %v284_v63, %v2556_v48  ;;  %v286_v2 = vpop.f32.mrb[35].mxu0  ;;  %1139 = vmatmul.mubr.bf16.gmra.mrb[80].mxu0 %v616_v52  ;;  %v552_v39 = vmax.f32 %v281_v57, 0.0  ;;  %v554_v33 = vmax.f32 %v442_v1, 0.0  ;;  %v446_v4 = vadd.f32 %v445_v32, %v2565_v55  ;;  %v447_v16 = vpop.f32.mrb[35].mxu1  ;;  %1300 = vmatmul.mubr.bf16.vlgmr.msra.gmra.mrb[52].mxu1 %v618_v36 }
 0x130   :  { %v287_v38 = vadd.f32 %v286_v2, %v2561_v50  ;;  %1226 = vmatpush1.bf16.msra.mxu0 %v2537_v40  ;;  %v553_v5 = vmax.f32 %v283_v37, 0.0  ;;  %v555_v7 = vmax.f32 %v444_v14, 0.0  ;;  %v448_v34 = vadd.f32 %v447_v16, %v2568_v59 }
 0x131   :  { %v556_v3 = vmax.f32 %v285_v22, 0.0  ;;  %1227 = vmatprep.subr.bf16.mxu0 %v2541_v41  ;;  %v558_v8 = vmax.f32 %v446_v4, 0.0 }
 0x132   :  { %v557_v6 = vmax.f32 %v287_v38, 0.0  ;;  %v559_v35 = vmax.f32 %v448_v34, 0.0 }
 0x133   :  { %v620_v28 = vpack.c.bf16 %v556_v3, %v552_v39  ;;  %v622_v40 = vpack.c.bf16 %v558_v8, %v554_v33 }
 0x134   :  { %v621_v29 = vpack.c.bf16 %v557_v6, %v553_v5  ;;  %v290_v11 = vpop.f32.mrb[36].mxu0  ;;  %1228 = vmatpush1.bf16.msra.mxu0 %v2543_v42  ;;  %v623_v24 = vpack.c.bf16 %v559_v35, %v555_v7  ;;  %v451_v46 = vpop.f32.mrb[36].mxu1 }
 0x135   :  { %v291_v15 = vadd.f32 %v290_v11, %v2556_v48  ;;  %v292_v43 = vpop.f32.mrb[37].mxu0  ;;  %v452_v20 = vadd.f32 %v451_v46, %v2565_v55  ;;  %v453_v31 = vpop.f32.mrb[37].mxu1 }
 0x136   :  { %v293_v30 = vadd.f32 %v292_v43, %v2561_v50  ;;  %v294_v41 = vpop.f32.mrb[38].mxu0  ;;  %1148 = vmatprep.mubr.bf16.mxu0 %v621_v29  ;;  %v454_v42 = vadd.f32 %v453_v31, %v2568_v59  ;;  %v455_v21 = vpop.f32.mrb[38].mxu1  ;;  %1309 = vmatprep.mubr.bf16.mxu1 %v623_v24 }
 0x137   :  { %v295_v25 = vadd.f32 %v294_v41, %v2556_v48  ;;  %v296_v52 = vpop.f32.mrb[39].mxu0  ;;  %1149 = vmatmul.mubr.bf16.gmra.mrb[84].mxu0 %v620_v28  ;;  %v560_v26 = vmax.f32 %v291_v15, 0.0  ;;  %v562_v57 = vmax.f32 %v452_v20, 0.0  ;;  %v456_v60 = vadd.f32 %v455_v21, %v2565_v55  ;;  %v457_v53 = vpop.f32.mrb[39].mxu1  ;;  %1310 = vmatmul.mubr.bf16.gmra.mrb[56].mxu1 %v622_v40 }
 0x138   :  { %v297_v17 = vadd.f32 %v296_v52, %v2561_v50  ;;  %v561_v37 = vmax.f32 %v293_v30, 0.0  ;;  %v563_v27 = vmax.f32 %v454_v42, 0.0  ;;  %v458_v22 = vadd.f32 %v457_v53, %v2568_v59 }
 0x139   :  { %v564_v36 = vmax.f32 %v295_v25, 0.0  ;;  %v566_v2 = vmax.f32 %v456_v60, 0.0 }
 0x13a   :  { %v565_v63 = vmax.f32 %v297_v17, 0.0  ;;  %v567_v38 = vmax.f32 %v458_v22, 0.0 }
 0x13b   :  { %v624_v1 = vpack.c.bf16 %v564_v36, %v560_v26  ;;  %v626_v32 = vpack.c.bf16 %v566_v2, %v562_v57 }
 0x13c   :  { %v625_v18 = vpack.c.bf16 %v565_v63, %v561_v37  ;;  %v300_v14 = vpop.f32.mrb[40].mxu0  ;;  %v627_v33 = vpack.c.bf16 %v567_v38, %v563_v27  ;;  %v461_v5 = vpop.f32.mrb[40].mxu1 }
 0x13d   :  { %v301_v39 = vadd.f32 %v300_v14, %v2556_v48  ;;  %v302_v3 = vpop.f32.mrb[41].mxu0  ;;  %v462_v7 = vadd.f32 %v461_v5, %v2565_v55  ;;  %v463_v28 = vpop.f32.mrb[41].mxu1 }
 0x13e   :  { %v303_v4 = vadd.f32 %v302_v3, %v2561_v50  ;;  %v304_v16 = vpop.f32.mrb[42].mxu0  ;;  %1158 = vmatprep.mubr.bf16.mxu0 %v625_v18  ;;  %v464_v29 = vadd.f32 %v463_v28, %v2568_v59  ;;  %v465_v35 = vpop.f32.mrb[42].mxu1  ;;  %1319 = vmatprep.mubr.bf16.mxu1 %v627_v33 }
 0x13f   :  { %v305_v6 = vadd.f32 %v304_v16, %v2556_v48  ;;  %v306_v34 = vpop.f32.mrb[43].mxu0  ;;  %1159 = vmatmul.mubr.bf16.gmra.mrb[88].mxu0 %v624_v1  ;;  %v568_v11 = vmax.f32 %v301_v39, 0.0  ;;  %v570_v15 = vmax.f32 %v462_v7, 0.0  ;;  %v466_v43 = vadd.f32 %v465_v35, %v2565_v55  ;;  %v467_v24 = vpop.f32.mrb[43].mxu1  ;;  %1320 = vmatmul.mubr.bf16.gmra.mrb[60].mxu1 %v626_v32 }
 0x140   :  { %v307_v8 = vadd.f32 %v306_v34, %v2561_v50  ;;  %v569_v30 = vmax.f32 %v303_v4, 0.0  ;;  %v571_v46 = vmax.f32 %v464_v29, 0.0  ;;  %v468_v25 = vadd.f32 %v467_v24, %v2568_v59 }
 0x141   :  { %v572_v40 = vmax.f32 %v305_v6, 0.0  ;;  %v574_v52 = vmax.f32 %v466_v43, 0.0 }
 0x142   :  { %v573_v41 = vmax.f32 %v307_v8, 0.0  ;;  %v575_v17 = vmax.f32 %v468_v25, 0.0 }
 0x143   :  { %v628_v20 = vpack.c.bf16 %v572_v40, %v568_v11  ;;  %v630_v21 = vpack.c.bf16 %v574_v52, %v570_v15 }
 0x144   :  { %v629_v31 = vpack.c.bf16 %v573_v41, %v569_v30  ;;  %v310_v42 = vpop.f32.mrb[44].mxu0  ;;  %v631_v57 = vpack.c.bf16 %v575_v17, %v571_v46  ;;  %v471_v37 = vpop.f32.mrb[44].mxu1 }
 0x145   :  { %v311_v26 = vadd.f32 %v310_v42, %v2556_v48  ;;  %v312_v36 = vpop.f32.mrb[45].mxu0  ;;  %v472_v27 = vadd.f32 %v471_v37, %v2565_v55  ;;  %v473_v1 = vpop.f32.mrb[45].mxu1 }
 0x146   :  { %v313_v60 = vadd.f32 %v312_v36, %v2561_v50  ;;  %v314_v53 = vpop.f32.mrb[46].mxu0  ;;  %1168 = vmatprep.mubr.bf16.mxu0 %v629_v31  ;;  %v474_v18 = vadd.f32 %v473_v1, %v2568_v59  ;;  %v475_v38 = vpop.f32.mrb[46].mxu1  ;;  %1329 = vmatprep.mubr.bf16.mxu1 %v631_v57 }
 0x147   :  { %v315_v63 = vadd.f32 %v314_v53, %v2556_v48  ;;  %v316_v22 = vpop.f32.mrb[47].mxu0  ;;  %1169 = vmatmul.mubr.bf16.gmra.mrb[92].mxu0 %v628_v20  ;;  %v576_v14 = vmax.f32 %v311_v26, 0.0  ;;  %v578_v39 = vmax.f32 %v472_v27, 0.0  ;;  %v476_v3 = vadd.f32 %v475_v38, %v2565_v55  ;;  %v477_v33 = vpop.f32.mrb[47].mxu1  ;;  %1330 = vmatmul.mubr.bf16.gmra.mrb[64].mxu1 %v630_v21 }
 0x148   :  { %v317_v2 = vadd.f32 %v316_v22, %v2561_v50  ;;  %v577_v4 = vmax.f32 %v313_v60, 0.0  ;;  %v579_v5 = vmax.f32 %v474_v18, 0.0  ;;  %v478_v6 = vadd.f32 %v477_v33, %v2568_v59  ;;  %v704_v60 = vld [vmem:[%s2935_s4] sm:$0x3] }
 0x149   :  { %v580_v32 = vmax.f32 %v315_v63, 0.0  ;;  %v582_v34 = vmax.f32 %v476_v3, 0.0  ;;  %v2794_v53 = vrot.slane %v704_v60, %v88_v45  ;;  %v2798_v37 = vrot.slane %v704_v60, %v92_v47 }
 0x14a   :  { %v581_v16 = vmax.f32 %v317_v2, 0.0  ;;  %v583_v8 = vmax.f32 %v478_v6, 0.0 }
 0x14b   :  { %v632_v7 = vpack.c.bf16 %v580_v32, %v576_v14  ;;  %v634_v35 = vpack.c.bf16 %v582_v34, %v578_v39 }
 0x14c   :  { %v633_v28 = vpack.c.bf16 %v581_v16, %v577_v4  ;;  %v320_v29 = vpop.f32.mrb[48].mxu0  ;;  %v635_v15 = vpack.c.bf16 %v583_v8, %v579_v5  ;;  %v481_v30 = vpop.f32.mrb[48].mxu1 }
 0x14d   :  { %v321_v11 = vadd.f32 %v320_v29, %v2556_v48  ;;  %v322_v40 = vpop.f32.mrb[49].mxu0  ;;  %v482_v46 = vadd.f32 %v481_v30, %v2565_v55  ;;  %v483_v25 = vpop.f32.mrb[49].mxu1  ;;  %v2191_v55 = vld [vmem:[%s2936_s5 + $0x40] sm:$0xff]  }
 0x14e   :  { %v323_v43 = vadd.f32 %v322_v40, %v2561_v50  ;;  %v324_v24 = vpop.f32.mrb[50].mxu0  ;;  %1178 = vmatprep.mubr.bf16.mxu0 %v633_v28  ;;  %1339 = vmatprep.mubr.bf16.mxu1 %v635_v15  ;;  %v484_v52 = vadd.f32 %v483_v25, %v2568_v59  ;;  %v485_v31 = vpop.f32.mrb[50].mxu1  ;;  %v2192_v59 = vld [vmem:[%s2936_s5] sm:$0xff]  }
 0x14f   :  { %v325_v41 = vpop.f32.mrb[51].mxu0  ;;  %1179 = vmatmul.mubr.bf16.gmra.mrb[96].mxu0 %v632_v7  ;;  %v584_v17 = vmax.f32 %v321_v11, 0.0  ;;  %v586_v42 = vmax.f32 %v482_v46, 0.0  ;;  %1340 = vmatmul.mubr.bf16.gmra.mrb[68].mxu1 %v634_v35  ;;  %v486_v48 = vpop.f32.mrb[51].mxu1 }
 0x150   :  { %v585_v20 = vmax.f32 %v323_v43, 0.0  ;;  %v587_v26 = vmax.f32 %v484_v52, 0.0  ;;  %1858 = vmatprep.subr.bf16.mxu1 %v2191_v55 }
 0x151   :  { %v636_v36 = vpack.c.bf16 %v584_v17, %v584_v17  ;;  %v638_v57 = vpack.c.bf16 %v586_v42, %v586_v42  ;;  %1859 = vmatpush3.bf16.msra.mxu1 %v2192_v59 }
 0x152   :  { %v637_v21 = vpack.c.bf16 %v585_v20, %v585_v20  ;;  %v639_v50 = vpack.c.bf16 %v587_v26, %v587_v26 }
 0x154   :  { %1188 = vmatprep.mubr.bf16.mxu0 %v637_v21  ;;  %1349 = vmatprep.mubr.bf16.mxu1 %v639_v50 }
 0x157   :  { %1189 = vmatmul.mubr.bf16.gmra.mrb[100].mxu0 %v636_v36  ;;  %1350 = vmatmul.mubr.bf16.gmra.mrb[72].mxu1 %v638_v57 }
 0x158   :  { %1229 = vmatprep.mubr.bf16.mxu0 %v2580_v61  ;;  %v2194_v61 = vld [vmem:[%s2936_s5 + $0x8] sm:$0xff]  }
 0x15f   :  { %1230 = vmatmul.mubr.bf16.vlgmr.msra.gmra.mrb[52].mxu0 %v2577_v58  ;;  %v2193_v58 = vld [vmem:[%s2936_s5 + $0x48] sm:$0xff]  }
 0x160   :  { %1239 = vmatprep.mubr.bf16.mxu0 %v2596_v62  ;;  %1860 = vmatprep.subr.bf16.mxu1 %v2193_v58  ;;  %v2196_v62 = vld [vmem:[%s2936_s5 + $0x10] sm:$0xff]  }
 0x161   :  { %1861 = vmatpush3.bf16.msra.mxu1 %v2194_v61 }
 0x167   :  { %1240 = vmatmul.mubr.bf16.gmra.mrb[56].mxu0 %v2593_v13  ;;  %v2195_v13 = vld [vmem:[%s2936_s5 + $0x50] sm:$0xff]  }
 0x168   :  { %1249 = vmatprep.mubr.bf16.mxu0 %v2612_v56  ;;  %1862 = vmatprep.subr.bf16.mxu1 %v2195_v13  ;;  %v2198_v56 = vld [vmem:[%s2936_s5 + $0x18] sm:$0xff]  }
 0x169   :  { %1863 = vmatpush3.bf16.msra.mxu1 %v2196_v62 }
 0x16f   :  { %1250 = vmatmul.mubr.bf16.gmra.mrb[60].mxu0 %v2609_v0  ;;  %v2197_v0 = vld [vmem:[%s2936_s5 + $0x58] sm:$0xff]  }
 0x170   :  { %1259 = vmatprep.mubr.bf16.mxu0 %v2628_v54  ;;  %1864 = vmatprep.subr.bf16.mxu1 %v2197_v0  ;;  %v2200_v54 = vld [vmem:[%s2936_s5 + $0x20] sm:$0xff]  }
 0x171   :  { %1865 = vmatpush3.bf16.msra.mxu1 %v2198_v56 }
 0x177   :  { %1260 = vmatmul.mubr.bf16.gmra.mrb[64].mxu0 %v2624_v9  ;;  %v2199_v9 = vld [vmem:[%s2936_s5 + $0x60] sm:$0xff]  }
 0x178   :  { %1269 = vmatprep.mubr.bf16.mxu0 %v2644_v51  ;;  %1866 = vmatprep.subr.bf16.mxu1 %v2199_v9  ;;  %v2202_v51 = vld [vmem:[%s2936_s5 + $0x28] sm:$0xff]  }
 0x179   :  { %1867 = vmatpush3.bf16.msra.mxu1 %v2200_v54 }
 0x17f   :  { %1270 = vmatmul.mubr.bf16.gmra.mrb[68].mxu0 %v2640_v49  ;;  %v2201_v49 = vld [vmem:[%s2936_s5 + $0x68] sm:$0xff]  }
 0x180   :  { %1279 = vmatprep.mubr.bf16.mxu0 %v2660_v12  ;;  %1868 = vmatprep.subr.bf16.mxu1 %v2201_v49  ;;  %v2204_v12 = vld [vmem:[%s2936_s5 + $0x30] sm:$0xff]  }
 0x181   :  { %1869 = vmatpush3.bf16.msra.mxu1 %v2202_v51 }
 0x187   :  { %1280 = vmatmul.mubr.bf16.gmra.mrb[72].mxu0 %v2656_v10  ;;  %v2203_v10 = vld [vmem:[%s2936_s5 + $0x70] sm:$0xff]  }
 0x188   :  { %1289 = vmatprep.mubr.bf16.mxu0 %v2676_v19  ;;  %1870 = vmatprep.subr.bf16.mxu1 %v2203_v10  ;;  %v2206_v19 = vld [vmem:[%s2936_s5 + $0x38] sm:$0xff]  }
 0x189   :  { %1871 = vmatpush3.bf16.msra.mxu1 %v2204_v12 }
 0x18f   :  { %1290 = vmatmul.mubr.bf16.gmra.mrb[76].mxu0 %v2672_v23  ;;  %v2205_v23 = vld [vmem:[%s2936_s5 + $0x78] sm:$0xff]  }
 0x190   :  { %1872 = vmatprep.subr.bf16.mxu1 %v2205_v23 }
 0x191   :  { %1873 = vmatpush3.bf16.msra.mxu1 %v2206_v19 }
 0x202   :  { %v1140_v63 = vpop.f32.mrb[80].mxu0  ;;  %v1301_v18 = vpop.f32.mrb[52].mxu1 }
 0x203   :  { %v1141_v27 = vadd.f32 %v1140_v63, %v2794_v53  ;;  %v1142_v22 = vpop.f32.mrb[81].mxu0  ;;  %v1303_v39 = vpop.f32.mrb[53].mxu1 }
 0x204   :  { %v1143_v1 = vadd.f32 %v1142_v22, %v2798_v37  ;;  %v1144_v2 = vpop.f32.mrb[82].mxu0  ;;  %v1305_v33 = vpop.f32.mrb[54].mxu1 }
 0x205   :  { %v1145_v38 = vadd.f32 %v1144_v2, %v2794_v53  ;;  %v1302_v14 = vadd.f32 %v1301_v18, %v1141_v27  ;;  %v1146_v32 = vpop.f32.mrb[83].mxu0  ;;  %v1307_v47 = vpop.f32.mrb[55].mxu1 }
 0x206   :  { %v1147_v45 = vadd.f32 %v1146_v32, %v2798_v37  ;;  %v1304_v3 = vadd.f32 %v1303_v39, %v1143_v1 }
 0x207   :  { %v1306_v44 = vadd.f32 %v1305_v33, %v1145_v38  ;;  %v1386_v16 = vmax.f32 %v1302_v14, 0.0 }
 0x208   :  { %v1308_v4 = vadd.f32 %v1307_v47, %v1147_v45  ;;  %v1387_v6 = vmax.f32 %v1304_v3, 0.0 }
 0x209   :  { %v1388_v5 = vmax.f32 %v1306_v44, 0.0 }
 0x20a   :  { %v1389_v7 = vmax.f32 %v1308_v4, 0.0  ;;  %v1150_v34 = vpop.f32.mrb[84].mxu0  ;;  %v1311_v15 = vpop.f32.mrb[56].mxu1 }
 0x20b   :  { %v2804_v28 = vpack.c.bf16 %v1388_v5, %v1386_v16  ;;  %v1151_v8 = vadd.f32 %v1150_v34, %v2794_v53  ;;  %v1152_v29 = vpop.f32.mrb[85].mxu0  ;;  %v1313_v41 = vpop.f32.mrb[57].mxu1 }
 0x20c   :  { %v2807_v35 = vpack.c.bf16 %v1389_v7, %v1387_v6  ;;  %v1153_v11 = vadd.f32 %v1152_v29, %v2798_v37  ;;  %v1154_v40 = vpop.f32.mrb[86].mxu0  ;;  %v1315_v20 = vpop.f32.mrb[58].mxu1 }
 0x20d   :  { %v1155_v43 = vadd.f32 %v1154_v40, %v2794_v53  ;;  %v1312_v24 = vadd.f32 %v1311_v15, %v1151_v8  ;;  %v1156_v30 = vpop.f32.mrb[87].mxu0  ;;  %v1317_v31 = vpop.f32.mrb[59].mxu1 }
 0x20e   :  { %v1157_v46 = vadd.f32 %v1156_v30, %v2798_v37  ;;  %v1314_v25 = vadd.f32 %v1313_v41, %v1153_v11 }
 0x20f   :  { %v1316_v52 = vadd.f32 %v1315_v20, %v1155_v43  ;;  %v1390_v42 = vmax.f32 %v1312_v24, 0.0 }
 0x210   :  { %v1318_v17 = vadd.f32 %v1317_v31, %v1157_v46  ;;  %v1391_v21 = vmax.f32 %v1314_v25, 0.0 }
 0x211   :  { %v1392_v48 = vmax.f32 %v1316_v52, 0.0 }
 0x212   :  { %v1393_v26 = vmax.f32 %v1318_v17, 0.0  ;;  %v1160_v50 = vpop.f32.mrb[88].mxu0  ;;  %v1321_v13 = vpop.f32.mrb[60].mxu1 }
 0x213   :  { %v2812_v36 = vpack.c.bf16 %v1392_v48, %v1390_v42  ;;  %v1161_v57 = vadd.f32 %v1160_v50, %v2794_v53  ;;  %v1162_v55 = vpop.f32.mrb[89].mxu0  ;;  %v1323_v9 = vpop.f32.mrb[61].mxu1 }
 0x214   :  { %v2815_v59 = vpack.c.bf16 %v1393_v26, %v1391_v21  ;;  %v1163_v58 = vadd.f32 %v1162_v55, %v2798_v37  ;;  %v1164_v61 = vpop.f32.mrb[90].mxu0  ;;  %v1325_v51 = vpop.f32.mrb[62].mxu1 }
 0x215   :  { %v1165_v62 = vadd.f32 %v1164_v61, %v2794_v53  ;;  %v1322_v0 = vadd.f32 %v1321_v13, %v1161_v57  ;;  %v1166_v56 = vpop.f32.mrb[91].mxu0  ;;  %v1327_v12 = vpop.f32.mrb[63].mxu1 }
 0x216   :  { %v1167_v54 = vadd.f32 %v1166_v56, %v2798_v37  ;;  %v1324_v49 = vadd.f32 %v1323_v9, %v1163_v58 }
 0x217   :  { %v1326_v10 = vadd.f32 %v1325_v51, %v1165_v62  ;;  %v1394_v19 = vmax.f32 %v1322_v0, 0.0 }
 0x218   :  { %v1328_v23 = vadd.f32 %v1327_v12, %v1167_v54  ;;  %v1395_v63 = vmax.f32 %v1324_v49, 0.0 }
 0x219   :  { %v1396_v60 = vmax.f32 %v1326_v10, 0.0 }
 0x21a   :  { %v1397_v27 = vmax.f32 %v1328_v23, 0.0  ;;  %v1170_v22 = vpop.f32.mrb[92].mxu0  ;;  %v1331_v39 = vpop.f32.mrb[64].mxu1 }
 0x21b   :  { %v2820_v1 = vpack.c.bf16 %v1396_v60, %v1394_v19  ;;  %v1171_v2 = vadd.f32 %v1170_v22, %v2794_v53  ;;  %v1172_v18 = vpop.f32.mrb[93].mxu0  ;;  %v1333_v44 = vpop.f32.mrb[65].mxu1 }
 0x21c   :  { %v2823_v38 = vpack.c.bf16 %v1397_v27, %v1395_v63  ;;  %v1173_v14 = vadd.f32 %v1172_v18, %v2798_v37  ;;  %v1174_v32 = vpop.f32.mrb[94].mxu0  ;;  %v1335_v16 = vpop.f32.mrb[66].mxu1 }
 0x21d   :  { %v1175_v45 = vadd.f32 %v1174_v32, %v2794_v53  ;;  %v1332_v3 = vadd.f32 %v1331_v39, %v1171_v2  ;;  %v1176_v33 = vpop.f32.mrb[95].mxu0  ;;  %v1337_v6 = vpop.f32.mrb[67].mxu1 }
 0x21e   :  { %v1177_v47 = vadd.f32 %v1176_v33, %v2798_v37  ;;  %v1334_v4 = vadd.f32 %v1333_v44, %v1173_v14 }
 0x21f   :  { %v1336_v5 = vadd.f32 %v1335_v16, %v1175_v45  ;;  %v1398_v34 = vmax.f32 %v1332_v3, 0.0 }
 0x220   :  { %v1338_v7 = vadd.f32 %v1337_v6, %v1177_v47  ;;  %v1399_v29 = vmax.f32 %v1334_v4, 0.0 }
 0x221   :  { %v1400_v8 = vmax.f32 %v1336_v5, 0.0 }
 0x222   :  { %v1401_v11 = vmax.f32 %v1338_v7, 0.0  ;;  %v1180_v40 = vpop.f32.mrb[96].mxu0  ;;  %v1341_v25 = vpop.f32.mrb[68].mxu1 }
 0x223   :  { %v2828_v15 = vpack.c.bf16 %v1400_v8, %v1398_v34  ;;  %v1181_v43 = vadd.f32 %v1180_v40, %v2794_v53  ;;  %v1182_v24 = vpop.f32.mrb[97].mxu0  ;;  %v1343_v17 = vpop.f32.mrb[69].mxu1 }
 0x224   :  { %v2831_v30 = vpack.c.bf16 %v1401_v11, %v1399_v29  ;;  %v1183_v41 = vadd.f32 %v1182_v24, %v2798_v37  ;;  %v1184_v46 = vpop.f32.mrb[98].mxu0  ;;  %v1345_v21 = vpop.f32.mrb[70].mxu1 }
 0x225   :  { %v1185_v20 = vadd.f32 %v1184_v46, %v2794_v53  ;;  %v1342_v52 = vadd.f32 %v1341_v25, %v1181_v43  ;;  %v1186_v31 = vpop.f32.mrb[99].mxu0  ;;  %v1347_v50 = vpop.f32.mrb[71].mxu1 }
 0x226   :  { %v1187_v42 = vadd.f32 %v1186_v31, %v2798_v37  ;;  %v1344_v48 = vadd.f32 %v1343_v17, %v1183_v41 }
 0x227   :  { %v1346_v26 = vadd.f32 %v1345_v21, %v1185_v20  ;;  %v1402_v55 = vmax.f32 %v1342_v52, 0.0 }
 0x228   :  { %v1348_v57 = vadd.f32 %v1347_v50, %v1187_v42  ;;  %v1403_v61 = vmax.f32 %v1344_v48, 0.0 }
 0x229   :  { %v1404_v58 = vmax.f32 %v1346_v26, 0.0 }
 0x22a   :  { %v1405_v13 = vmax.f32 %v1348_v57, 0.0  ;;  %v1190_v62 = vpop.f32.mrb[100].mxu0  ;;  %v1351_v10 = vpop.f32.mrb[72].mxu1 }
 0x22b   :  { %v2836_v0 = vpack.c.bf16 %v1404_v58, %v1402_v55  ;;  %v1191_v56 = vadd.f32 %v1190_v62, %v2794_v53  ;;  %v1192_v9 = vpop.f32.mrb[101].mxu0  ;;  %v1353_v19 = vpop.f32.mrb[73].mxu1 }
 0x22c   :  { %v2839_v54 = vpack.c.bf16 %v1405_v13, %v1403_v61  ;;  %v1193_v49 = vadd.f32 %v1192_v9, %v2798_v37  ;;  %v1194_v51 = vpop.f32.mrb[102].mxu0  ;;  %v1355_v63 = vpop.f32.mrb[74].mxu1 }
 0x22d   :  { %v2842_v12 = vadd.f32 %v1351_v10, %v1191_v56  ;;  %v1195_v23 = vpop.f32.mrb[103].mxu0  ;;  %v1356_v27 = vpop.f32.mrb[75].mxu1 }
 0x22e   :  { %v2844_v60 = vadd.f32 %v1353_v19, %v1193_v49 }
 0x232   :  { %v1231_v22 = vpop.f32.mrb[52].mxu0 }
 0x233   :  { %v1984_v2 = vadd.f32 %v1231_v22, %v2794_v53  ;;  %v1233_v18 = vpop.f32.mrb[53].mxu0 }
 0x234   :  { %v1985_v14 = vadd.f32 %v1233_v18, %v2798_v37  ;;  %v1235_v32 = vpop.f32.mrb[54].mxu0 }
 0x235   :  { %v1986_v39 = vadd.f32 %v1235_v32, %v2794_v53  ;;  %v1237_v45 = vpop.f32.mrb[55].mxu0  ;;  %v1358_v33 = vmax.f32 %v1984_v2, 0.0 }
 0x236   :  { %v1987_v3 = vadd.f32 %v1237_v45, %v2798_v37  ;;  %v1359_v47 = vmax.f32 %v1985_v14, 0.0 }
 0x237   :  { %v1360_v44 = vmax.f32 %v1986_v39, 0.0 }
 0x238   :  { %v1361_v4 = vmax.f32 %v1987_v3, 0.0 }
 0x239   :  { %v1408_v16 = vpack.c.bf16 %v1360_v44, %v1358_v33 }
 0x23a   :  { %v1409_v5 = vpack.c.bf16 %v1361_v4, %v1359_v47  ;;  %v1241_v6 = vpop.f32.mrb[56].mxu0 }
 0x23b   :  { %v1988_v7 = vadd.f32 %v1241_v6, %v2794_v53  ;;  %v1243_v34 = vpop.f32.mrb[57].mxu0 }
 0x23c   :  { %v1989_v8 = vadd.f32 %v1243_v34, %v2798_v37  ;;  %v1245_v29 = vpop.f32.mrb[58].mxu0  ;;  %1601 = vmatprep.mubr.bf16.mxu1 %v1409_v5 }
 0x23d   :  { %v1990_v11 = vadd.f32 %v1245_v29, %v2794_v53  ;;  %v1247_v40 = vpop.f32.mrb[59].mxu0  ;;  %1602 = vmatmul.mubr.bf16.vlgmr.msra.gmra.mrb[76].mxu1 %v1408_v16  ;;  %v1362_v24 = vmax.f32 %v1988_v7, 0.0 }
 0x23e   :  { %v1991_v43 = vadd.f32 %v1247_v40, %v2798_v37  ;;  %v1363_v46 = vmax.f32 %v1989_v8, 0.0 }
 0x23f   :  { %v1364_v41 = vmax.f32 %v1990_v11, 0.0 }
 0x240   :  { %v1365_v25 = vmax.f32 %v1991_v43, 0.0 }
 0x241   :  { %v1410_v20 = vpack.c.bf16 %v1364_v41, %v1362_v24 }
 0x242   :  { %v1411_v52 = vpack.c.bf16 %v1365_v25, %v1363_v46  ;;  %v1251_v31 = vpop.f32.mrb[60].mxu0 }
 0x243   :  { %v1992_v17 = vadd.f32 %v1251_v31, %v2794_v53  ;;  %v1253_v42 = vpop.f32.mrb[61].mxu0 }
 0x244   :  { %v1993_v48 = vadd.f32 %v1253_v42, %v2798_v37  ;;  %v1255_v21 = vpop.f32.mrb[62].mxu0  ;;  %1609 = vmatprep.mubr.bf16.mxu1 %v1411_v52 }
 0x245   :  { %v1994_v26 = vadd.f32 %v1255_v21, %v2794_v53  ;;  %v1257_v50 = vpop.f32.mrb[63].mxu0  ;;  %1610 = vmatmul.mubr.bf16.gmra.mrb[80].mxu1 %v1410_v20  ;;  %v1366_v55 = vmax.f32 %v1992_v17, 0.0 }
 0x246   :  { %v1995_v57 = vadd.f32 %v1257_v50, %v2798_v37  ;;  %v1367_v61 = vmax.f32 %v1993_v48, 0.0 }
 0x247   :  { %v1368_v58 = vmax.f32 %v1994_v26, 0.0 }
 0x248   :  { %v1369_v13 = vmax.f32 %v1995_v57, 0.0 }
 0x249   :  { %v1412_v62 = vpack.c.bf16 %v1368_v58, %v1366_v55 }
 0x24a   :  { %v1413_v56 = vpack.c.bf16 %v1369_v13, %v1367_v61  ;;  %v1261_v9 = vpop.f32.mrb[64].mxu0 }
 0x24b   :  { %v1996_v49 = vadd.f32 %v1261_v9, %v2794_v53  ;;  %v1263_v51 = vpop.f32.mrb[65].mxu0 }
 0x24c   :  { %v1997_v10 = vadd.f32 %v1263_v51, %v2798_v37  ;;  %v1265_v23 = vpop.f32.mrb[66].mxu0  ;;  %1617 = vmatprep.mubr.bf16.mxu1 %v1413_v56 }
 0x24d   :  { %v1998_v19 = vadd.f32 %v1265_v23, %v2794_v53  ;;  %v1267_v63 = vpop.f32.mrb[67].mxu0  ;;  %1618 = vmatmul.mubr.bf16.gmra.mrb[84].mxu1 %v1412_v62  ;;  %v1370_v22 = vmax.f32 %v1996_v49, 0.0 }
 0x24e   :  { %v1999_v27 = vadd.f32 %v1267_v63, %v2798_v37  ;;  %v1371_v18 = vmax.f32 %v1997_v10, 0.0 }
 0x24f   :  { %v1372_v2 = vmax.f32 %v1998_v19, 0.0 }
 0x250   :  { %v1373_v14 = vmax.f32 %v1999_v27, 0.0 }
 0x251   :  { %v1414_v32 = vpack.c.bf16 %v1372_v2, %v1370_v22 }
 0x252   :  { %v1415_v39 = vpack.c.bf16 %v1373_v14, %v1371_v18  ;;  %v1271_v45 = vpop.f32.mrb[68].mxu0 }
 0x253   :  { %v2000_v3 = vadd.f32 %v1271_v45, %v2794_v53  ;;  %v1273_v33 = vpop.f32.mrb[69].mxu0 }
 0x254   :  { %v2001_v44 = vadd.f32 %v1273_v33, %v2798_v37  ;;  %v1275_v47 = vpop.f32.mrb[70].mxu0  ;;  %1625 = vmatprep.mubr.bf16.mxu1 %v1415_v39 }
 0x255   :  { %v2002_v4 = vadd.f32 %v1275_v47, %v2794_v53  ;;  %v1277_v16 = vpop.f32.mrb[71].mxu0  ;;  %1626 = vmatmul.mubr.bf16.gmra.mrb[88].mxu1 %v1414_v32  ;;  %v1374_v6 = vmax.f32 %v2000_v3, 0.0 }
 0x256   :  { %v2003_v5 = vadd.f32 %v1277_v16, %v2798_v37  ;;  %v1375_v34 = vmax.f32 %v2001_v44, 0.0 }
 0x257   :  { %v1376_v7 = vmax.f32 %v2002_v4, 0.0 }
 0x258   :  { %v1377_v8 = vmax.f32 %v2003_v5, 0.0 }
 0x259   :  { %v1416_v29 = vpack.c.bf16 %v1376_v7, %v1374_v6 }
 0x25a   :  { %v1417_v11 = vpack.c.bf16 %v1377_v8, %v1375_v34  ;;  %v1281_v40 = vpop.f32.mrb[72].mxu0 }
 0x25b   :  { %v2004_v43 = vadd.f32 %v1281_v40, %v2794_v53  ;;  %v1283_v24 = vpop.f32.mrb[73].mxu0 }
 0x25c   :  { %v2005_v41 = vadd.f32 %v1283_v24, %v2798_v37  ;;  %v1285_v46 = vpop.f32.mrb[74].mxu0  ;;  %1633 = vmatprep.mubr.bf16.mxu1 %v1417_v11 }
 0x25d   :  { %v2006_v25 = vadd.f32 %v1285_v46, %v2794_v53  ;;  %v1287_v20 = vpop.f32.mrb[75].mxu0  ;;  %1634 = vmatmul.mubr.bf16.gmra.mrb[92].mxu1 %v1416_v29  ;;  %v1378_v31 = vmax.f32 %v2004_v43, 0.0 }
 0x25e   :  { %v2007_v52 = vadd.f32 %v1287_v20, %v2798_v37  ;;  %v1379_v42 = vmax.f32 %v2005_v41, 0.0 }
 0x25f   :  { %v1380_v17 = vmax.f32 %v2006_v25, 0.0 }
 0x260   :  { %v1381_v48 = vmax.f32 %v2007_v52, 0.0 }
 0x261   :  { %v1418_v21 = vpack.c.bf16 %v1380_v17, %v1378_v31 }
 0x262   :  { %v1419_v26 = vpack.c.bf16 %v1381_v48, %v1379_v42  ;;  %v1291_v50 = vpop.f32.mrb[76].mxu0 }
 0x263   :  { %v2008_v57 = vadd.f32 %v1291_v50, %v2794_v53  ;;  %v1293_v55 = vpop.f32.mrb[77].mxu0 }
 0x264   :  { %v2009_v58 = vadd.f32 %v1293_v55, %v2798_v37  ;;  %v1295_v61 = vpop.f32.mrb[78].mxu0  ;;  %1641 = vmatprep.mubr.bf16.mxu1 %v1419_v26 }
 0x265   :  { %v2010_v13 = vadd.f32 %v1295_v61, %v2794_v53  ;;  %v1297_v62 = vpop.f32.mrb[79].mxu0  ;;  %1642 = vmatmul.mubr.bf16.gmra.mrb[96].mxu1 %v1418_v21  ;;  %v1382_v9 = vmax.f32 %v2008_v57, 0.0  ;;  %v1407_v53 = vmax.f32 %v2844_v60, 0.0 }
 0x266   :  { %v2011_v56 = vadd.f32 %v1297_v62, %v2798_v37  ;;  %v1383_v51 = vmax.f32 %v2009_v58, 0.0 }
 0x267   :  { %v1384_v49 = vmax.f32 %v2010_v13, 0.0  ;;  %v1433_v37 = vpack.c.bf16 %v1407_v53, %v1407_v53 }
 0x268   :  { %v1385_v10 = vmax.f32 %v2011_v56, 0.0 }
 0x269   :  { %v1420_v23 = vpack.c.bf16 %v1384_v49, %v1382_v9 }
 0x26a   :  { %v1421_v19 = vpack.c.bf16 %v1385_v10, %v1383_v51 }
 0x26c   :  { %1649 = vmatprep.mubr.bf16.mxu1 %v1421_v19 }
 0x26d   :  { %1650 = vmatmul.mubr.bf16.gmra.mrb[100].mxu1 %v1420_v23 }
 0x26e   :  { %1657 = vmatprep.mubr.bf16.mxu1 %v2807_v35 }
 0x275   :  { %1658 = vmatmul.mubr.bf16.gmra.mrb[104].mxu1 %v2804_v28  ;;  %v1406_v28 = vmax.f32 %v2842_v12, 0.0 }
 0x276   :  { %1665 = vmatprep.mubr.bf16.mxu1 %v2815_v59  ;;  %v2889_v59 = vld [vmem:[%s2937_s6] ss:$0 sm:$0xff]  ;;  %s2259_s6 = smov [#allocation5]  }
 0x277   :  { %v1432_v35 = vpack.c.bf16 %v1406_v28, %v1406_v28  ;;  %s1735_s13 = sshll.u32 %s2259_s6, 4  ;;  %s1736_s13 = int_to_ptr.vmem [resolvable:$true] %s1735_s13 }
 0x278   :  { %s2229_s14 = scalar_lea.vmem %s1736_s13, 3200  ;;  %p2234_p9 = scmp.lt.s32.totalorder %s1736_s13, %s1736_s13 }
 0x279   :  { %p2230_p8 = scmp.ne.s32.totalorder %s1736_s13, %s2229_s14  ;;  %p2235_p10 = scmp.lt.s32.totalorder %s2229_s14, %s2229_s14 }
 0x27b   :  { %p2236_p11 = por %p2235_p10, %p2234_p9 }
 0x27d   :  { %1666 = vmatmul.mubr.bf16.gmra.mrb[108].mxu1 %v2812_v36  ;;  %p2237_p12 = pnand %p2236_p11, %p2230_p8 }
 0x27e   :  { %1673 = vmatprep.mubr.bf16.mxu1 %v2823_v38 }
 0x285   :  { %1674 = vmatmul.mubr.bf16.gmra.mrb[112].mxu1 %v2820_v1 }
 0x286   :  { %1681 = vmatprep.mubr.bf16.mxu1 %v2831_v30 }
 0x28d   :  { %1682 = vmatmul.mubr.bf16.gmra.mrb[116].mxu1 %v2828_v15 }
 0x28e   :  { %1689 = vmatprep.mubr.bf16.mxu1 %v2839_v54 }
 0x295   :  { %1690 = vmatmul.mubr.bf16.gmra.mrb[120].mxu1 %v2836_v0 }
 0x296   :  { %1697 = vmatprep.mubr.bf16.mxu1 %v1433_v37 }
 0x29d   :  { %1698 = vmatmul.mubr.bf16.gmra.mrb[124].mxu1 %v1432_v35 }
 0x310   :  { %v1874_v36 = vpop.f32.mrb[76].mxu1 }
 0x311   :  { %v1875_v1 = vpop.f32.mrb[77].mxu1 }
 0x312   :  { %v1876_v38 = vadd.f32 %v1875_v1, %v1874_v36  ;;  %v1877_v15 = vpop.f32.mrb[78].mxu1 }
 0x313   :  { %v1878_v30 = vpop.f32.mrb[79].mxu1 }
 0x314   :  { %v1604_v54 = vadd.f32 %v1876_v38, %v2889_v59  ;;  %v1879_v60 = vadd.f32 %v1878_v30, %v1877_v15 }
 0x316   :  { %1705 = vst [vmem:[#allocation5] sm:$0xff] %v1604_v54  ;;  %v1607_v0 = vadd.f32 %v1879_v60, %v2889_v59 }
 0x318   :  { %1706 = vst [vmem:[#allocation5 + $0x8] sm:$0xff] %v1607_v0  ;;  %v1880_v12 = vpop.f32.mrb[80].mxu1 }
 0x319   :  { %v1881_v63 = vpop.f32.mrb[81].mxu1 }
 0x31a   :  { %v1882_v27 = vadd.f32 %v1881_v63, %v1880_v12  ;;  %v1883_v22 = vpop.f32.mrb[82].mxu1 }
 0x31b   :  { %v1884_v2 = vpop.f32.mrb[83].mxu1 }
 0x31c   :  { %v1612_v18 = vadd.f32 %v1882_v27, %v2889_v59  ;;  %v1885_v14 = vadd.f32 %v1884_v2, %v1883_v22 }
 0x31e   :  { %1707 = vst [vmem:[#allocation5 + $0x10] sm:$0xff] %v1612_v18  ;;  %v1615_v32 = vadd.f32 %v1885_v14, %v2889_v59 }
 0x320   :  { %1708 = vst [vmem:[#allocation5 + $0x18] sm:$0xff] %v1615_v32  ;;  %v1886_v39 = vpop.f32.mrb[84].mxu1 }
 0x321   :  { %v1887_v45 = vpop.f32.mrb[85].mxu1 }
 0x322   :  { %v1888_v3 = vadd.f32 %v1887_v45, %v1886_v39  ;;  %v1889_v33 = vpop.f32.mrb[86].mxu1 }
 0x323   :  { %v1890_v44 = vpop.f32.mrb[87].mxu1 }
 0x324   :  { %v1620_v47 = vadd.f32 %v1888_v3, %v2889_v59  ;;  %v1891_v4 = vadd.f32 %v1890_v44, %v1889_v33 }
 0x326   :  { %1709 = vst [vmem:[#allocation5 + $0x20] sm:$0xff] %v1620_v47  ;;  %v1623_v16 = vadd.f32 %v1891_v4, %v2889_v59 }
 0x328   :  { %1710 = vst [vmem:[#allocation5 + $0x28] sm:$0xff] %v1623_v16  ;;  %v1892_v5 = vpop.f32.mrb[88].mxu1 }
 0x329   :  { %v1893_v6 = vpop.f32.mrb[89].mxu1 }
 0x32a   :  { %v1894_v7 = vadd.f32 %v1893_v6, %v1892_v5  ;;  %v1895_v34 = vpop.f32.mrb[90].mxu1 }
 0x32b   :  { %v1896_v8 = vpop.f32.mrb[91].mxu1 }
 0x32c   :  { %v1628_v29 = vadd.f32 %v1894_v7, %v2889_v59  ;;  %v1897_v11 = vadd.f32 %v1896_v8, %v1895_v34 }
 0x32e   :  { %1711 = vst [vmem:[#allocation5 + $0x30] sm:$0xff] %v1628_v29  ;;  %v1631_v40 = vadd.f32 %v1897_v11, %v2889_v59 }
 0x330   :  { %1712 = vst [vmem:[#allocation5 + $0x38] sm:$0xff] %v1631_v40  ;;  %v1898_v43 = vpop.f32.mrb[92].mxu1 }
 0x331   :  { %v1899_v24 = vpop.f32.mrb[93].mxu1 }
 0x332   :  { %v1900_v41 = vadd.f32 %v1899_v24, %v1898_v43  ;;  %v1901_v46 = vpop.f32.mrb[94].mxu1 }
 0x333   :  { %v1902_v25 = vpop.f32.mrb[95].mxu1 }
 0x334   :  { %v1636_v20 = vadd.f32 %v1900_v41, %v2889_v59  ;;  %v1903_v52 = vadd.f32 %v1902_v25, %v1901_v46 }
 0x336   :  { %1713 = vst [vmem:[#allocation5 + $0x40] sm:$0xff] %v1636_v20  ;;  %v1639_v31 = vadd.f32 %v1903_v52, %v2889_v59 }
 0x338   :  { %1714 = vst [vmem:[#allocation5 + $0x48] sm:$0xff] %v1639_v31  ;;  %v1904_v17 = vpop.f32.mrb[96].mxu1 }
 0x339   :  { %v1905_v42 = vpop.f32.mrb[97].mxu1 }
 0x33a   :  { %v1906_v48 = vadd.f32 %v1905_v42, %v1904_v17  ;;  %v1907_v21 = vpop.f32.mrb[98].mxu1 }
 0x33b   :  { %v1908_v26 = vpop.f32.mrb[99].mxu1 }
 0x33c   :  { %v1644_v50 = vadd.f32 %v1906_v48, %v2889_v59  ;;  %v1909_v57 = vadd.f32 %v1908_v26, %v1907_v21 }
 0x33e   :  { %1715 = vst [vmem:[#allocation5 + $0x50] sm:$0xff] %v1644_v50  ;;  %v1647_v55 = vadd.f32 %v1909_v57, %v2889_v59 }
 0x340   :  { %1716 = vst [vmem:[#allocation5 + $0x58] sm:$0xff] %v1647_v55  ;;  %v1910_v58 = vpop.f32.mrb[100].mxu1 }
 0x341   :  { %v1911_v61 = vpop.f32.mrb[101].mxu1 }
 0x342   :  { %v1912_v13 = vadd.f32 %v1911_v61, %v1910_v58  ;;  %v1913_v62 = vpop.f32.mrb[102].mxu1 }
 0x343   :  { %v1914_v56 = vpop.f32.mrb[103].mxu1 }
 0x344   :  { %v1652_v9 = vadd.f32 %v1912_v13, %v2889_v59  ;;  %v1915_v49 = vadd.f32 %v1914_v56, %v1913_v62 }
 0x346   :  { %1717 = vst [vmem:[#allocation5 + $0x60] sm:$0xff] %v1652_v9  ;;  %v1655_v51 = vadd.f32 %v1915_v49, %v2889_v59 }
 0x348   :  { %1718 = vst [vmem:[#allocation5 + $0x68] sm:$0xff] %v1655_v51  ;;  %v1916_v10 = vpop.f32.mrb[104].mxu1 }
 0x349   :  { %v1917_v23 = vpop.f32.mrb[105].mxu1 }
 0x34a   :  { %v1918_v19 = vadd.f32 %v1917_v23, %v1916_v10  ;;  %v1919_v53 = vpop.f32.mrb[106].mxu1 }
 0x34b   :  { %v1920_v37 = vpop.f32.mrb[107].mxu1 }
 0x34c   :  { %v1660_v28 = vadd.f32 %v1918_v19, %v2889_v59  ;;  %v1921_v35 = vadd.f32 %v1920_v37, %v1919_v53 }
 0x34e   :  { %1719 = vst [vmem:[#allocation5 + $0x70] sm:$0xff] %v1660_v28  ;;  %v1663_v36 = vadd.f32 %v1921_v35, %v2889_v59 }
 0x350   :  { %1720 = vst [vmem:[#allocation5 + $0x78] sm:$0xff] %v1663_v36  ;;  %v1922_v1 = vpop.f32.mrb[108].mxu1 }
 0x351   :  { %v1923_v38 = vpop.f32.mrb[109].mxu1 }
 0x352   :  { %v1924_v15 = vadd.f32 %v1923_v38, %v1922_v1  ;;  %v1925_v30 = vpop.f32.mrb[110].mxu1 }
 0x353   :  { %v1926_v54 = vpop.f32.mrb[111].mxu1 }
 0x354   :  { %v1668_v60 = vadd.f32 %v1924_v15, %v2889_v59  ;;  %v1927_v0 = vadd.f32 %v1926_v54, %v1925_v30 }
 0x356   :  { %1721 = vst [vmem:[#allocation5 + $0x80] sm:$0xff] %v1668_v60  ;;  %v1671_v12 = vadd.f32 %v1927_v0, %v2889_v59 }
 0x358   :  { %1722 = vst [vmem:[#allocation5 + $0x88] sm:$0xff] %v1671_v12  ;;  %v1928_v63 = vpop.f32.mrb[112].mxu1 }
 0x359   :  { %v1929_v27 = vpop.f32.mrb[113].mxu1 }
 0x35a   :  { %v1930_v22 = vadd.f32 %v1929_v27, %v1928_v63  ;;  %v1931_v2 = vpop.f32.mrb[114].mxu1 }
 0x35b   :  { %v1932_v18 = vpop.f32.mrb[115].mxu1 }
 0x35c   :  { %v1676_v14 = vadd.f32 %v1930_v22, %v2889_v59  ;;  %v1933_v32 = vadd.f32 %v1932_v18, %v1931_v2 }
 0x35e   :  { %1723 = vst [vmem:[#allocation5 + $0x90] sm:$0xff] %v1676_v14  ;;  %v1679_v39 = vadd.f32 %v1933_v32, %v2889_v59 }
 0x360   :  { %1724 = vst [vmem:[#allocation5 + $0x98] sm:$0xff] %v1679_v39  ;;  %v1934_v45 = vpop.f32.mrb[116].mxu1 }
 0x361   :  { %v1935_v3 = vpop.f32.mrb[117].mxu1 }
 0x362   :  { %v1936_v33 = vadd.f32 %v1935_v3, %v1934_v45  ;;  %v1937_v44 = vpop.f32.mrb[118].mxu1 }
 0x363   :  { %v1938_v47 = vpop.f32.mrb[119].mxu1 }
 0x364   :  { %v1684_v4 = vadd.f32 %v1936_v33, %v2889_v59  ;;  %v1939_v16 = vadd.f32 %v1938_v47, %v1937_v44 }
 0x366   :  { %1725 = vst [vmem:[#allocation5 + $0xa0] sm:$0xff] %v1684_v4  ;;  %v1687_v5 = vadd.f32 %v1939_v16, %v2889_v59 }
 0x368   :  { %1726 = vst [vmem:[#allocation5 + $0xa8] sm:$0xff] %v1687_v5  ;;  %v1940_v6 = vpop.f32.mrb[120].mxu1 }
 0x369   :  { %v1941_v7 = vpop.f32.mrb[121].mxu1 }
 0x36a   :  { %v1942_v34 = vadd.f32 %v1941_v7, %v1940_v6  ;;  %v1943_v8 = vpop.f32.mrb[122].mxu1 }
 0x36b   :  { %v1944_v29 = vpop.f32.mrb[123].mxu1 }
 0x36c   :  { %v1692_v11 = vadd.f32 %v1942_v34, %v2889_v59  ;;  %v1945_v40 = vadd.f32 %v1944_v29, %v1943_v8 }
 0x36e   :  { %1727 = vst [vmem:[#allocation5 + $0xb0] sm:$0xff] %v1692_v11  ;;  %v1695_v43 = vadd.f32 %v1945_v40, %v2889_v59 }
 0x370   :  { %1728 = vst [vmem:[#allocation5 + $0xb8] sm:$0xff] %v1695_v43  ;;  %v1946_v24 = vpop.f32.mrb[124].mxu1 }
 0x371   :  { %v1947_v41 = vpop.f32.mrb[125].mxu1 }
 0x372   :  { %v1948_v46 = vadd.f32 %v1947_v41, %v1946_v24  ;;  %v1949_v25 = vpop.f32.mrb[126].mxu1 }
 0x373   :  { %v1950_v20 = vpop.f32.mrb[127].mxu1 }
 0x374   :  { %v1700_v52 = vadd.f32 %v1948_v46, %v2889_v59 }
 0x376   :  { %1729 = vst [vmem:[#allocation5 + $0xc0] sm:$0xff] %v1700_v52 }
 0x377   :  { %2240 = shalt.err (!%p2237_p12)
}
 0x378   :  { %s2241_s17 = scalar_lea.hbm %s2938_s7, 3200 }
 0x379   :  { %p2242_p13 = scmp.ne.s32.totalorder %s2938_s7, %s2241_s17  ;;  %p2245_p0 = scmp.lt.u32.totalorder %s2241_s17, %s2938_s7 }
 0x37b   :  { %p2247_p1 = pnand %p2245_p0, %p2242_p13 }
 0x37d   :  { %2250 = shalt.err (!%p2247_p1)
}
 0x37e   :  { %1741 = dma.vmem_to_hbm [thread:$0]  %s1736_s13, 3200, %s2938_s7, [#allocation4], %s2256_s11, %s2256_s11, %s2257_s12  }
 0x37f   :  { %2253 = dma.done.wait [#allocation4], 3200  }
 0x380   :  { %2254 = vsyncadd [#allocation4], 4294964096 }
 0x381   :  { %1745 = vsyncpa [#allocation3], 1 }
 0x382   :  { %1746 = vsyncpa [#allocation4], 1 }

</bundles_post_ra>
